<compile_context>
chip_gen: v6e
topology: v6e:2x2x1
jax: 0.10.0
libtpu: 0.0.40
codegen_flags: <defaults>
</compile_context>

<pallas_src>
import jax
import jax.numpy as jnp
from jax.experimental import pallas as pl
from jax.experimental.pallas import tpu as pltpu

EPS = 1e-5
KH = KW = 3  # kernel_size=3, padding=1 (SAME)


# ----------------------------------------------------------------------------
# Pass 1: conv (3x3, SAME) via 9 accumulating MXU taps + per-tile BN partials.
# ----------------------------------------------------------------------------
def _conv_stats_kernel(x_ref, w_ref, y_ref, psum_ref, psumsq_ref):
    # x_ref:      (1, H+2, W+2, Cin)   padded NHWC input for one batch element
    # w_ref:      (9, Cout, Cin)       one (Cout, Cin) weight matrix per 3x3 tap
    # y_ref:      (1, Cout, TH*W)      conv output tile, lane-dense (intermediate dtype)
    # psum_ref:   (1, 1, Cout, 1)      per-tile per-channel sum (f32)
    # psumsq_ref: (1, 1, Cout, 1)      per-tile per-channel CENTERED sum of squares (f32)
    _, Hp, Wp, Cin = x_ref.shape
    W = Wp - 2
    M = y_ref.shape[-1]
    TH = M // W
    h = pl.program_id(1)

    row0 = h * TH
    if TH % 8 == 0:
        row0 = pl.multiple_of(row0, 8)  # aligned-load hint for the sublane slices

    # 9 accumulating MXU contractions on shifted views of the resident padded image.
    # No im2col scratch and no lane-masked scatter stores.
    acc = None
    for ky in range(KH):
        for kx in range(KW):
            slab = x_ref[0, pl.ds(row0 + ky, TH), kx:kx + W, :]       # (TH, W, Cin)
            rhs = slab.reshape(TH * W, Cin)                           # layout-preserving for W % 8 == 0
            part = jax.lax.dot_general(
                w_ref[ky * KW + kx], rhs,
                dimension_numbers=(((1,), (1,)), ((), ())),           # (Cout,Cin) x (M,Cin)^T
                preferred_element_type=jnp.float32)                   # (Cout, M)
            acc = part if acc is None else acc + part

    # BN partials from the live f32 accumulator.  Sum-of-squares is centered about the
    # tile mean so the wrapper can combine tiles Welford-style.
    s = jnp.sum(acc, axis=1, keepdims=True)                           # (Cout, 1)
    mu = s * jnp.float32(1.0 / M)
    d = acc - mu
    psum_ref[0, 0] = s
    psumsq_ref[0, 0] = jnp.sum(d * d, axis=1, keepdims=True)

    # Lane-dense (Cout, M) store; the final NCHW tensor is a free reshape in the wrapper.
    y_ref[0] = acc.astype(y_ref.dtype)


# ----------------------------------------------------------------------------
# Pass 2: fused BN affine + ReLU (per-channel scale/shift precomputed in wrapper).
# ----------------------------------------------------------------------------
def _bn_relu_kernel(y_ref, scale_ref, shift_ref, o_ref):
    # y_ref: (1, Cout, TC) intermediate dtype; scale/shift: (Cout, 1) f32; o_ref: f32.
    y = y_ref[0].astype(jnp.float32)
    z = y * scale_ref[...] + shift_ref[...]
    o_ref[0] = jnp.maximum(z, jnp.float32(0.0)).astype(o_ref.dtype)


# ----------------------------------------------------------------------------
# Generation-aware sizing helpers.
# ----------------------------------------------------------------------------
def _vmem_capacity_bytes():
    try:
        info = pltpu.get_tpu_info()
        cap = getattr(info, "vmem_capacity_bytes", None)
        if cap:
            return int(cap)
    except Exception:
        pass
    return 64 * 1024 * 1024  # conservative fallback (v7x-sized VMEM)


def _pick_tile_rows(H, W, Cin, Cout, in_bytes, inter_bytes, vmem_budget):
    """Largest row-tile TH dividing H with lane-dense TH*W that fits the VMEM budget."""
    Hp, Wp = H + 2, W + 2
    # Resident padded image is double-buffered by the pipeline; weights are tiny.
    fixed = 2 * Hp * Wp * Cin * in_bytes + 2 * KH * KW * Cout * Cin * in_bytes
    # Per output row: y tile (double-buffered), ~3 live f32 accumulator-sized temporaries,
    # and a few shifted-slab temporaries.
    per_row = W * (2 * Cout * inter_bytes + 3 * Cout * 4 + 4 * Cin * in_bytes)
    avail = max(vmem_budget - fixed, per_row)
    cap = min(H, max(1, avail // per_row), max(1, 32768 // max(W, 1)))
    for th in range(int(cap), 0, -1):
        if H % th == 0 and (th * W) % 128 == 0:
            return th
    # No lane-dense divisor under the cap: whole-H rows (always a legal full-extent block).
    return H


def _pick_tile_cols(M, Cout, vmem_budget):
    """Largest lane-dense column tile for the streaming BN/ReLU pass."""
    per_col = Cout * (2 * 2 + 2 * 4 + 8)   # bf16 in x2 buf + f32 out x2 buf + working f32
    cap = max(1, min(M, vmem_budget // max(per_col, 1), 32768))
    for tc in range(int(cap), 0, -1):
        if M % tc == 0 and (tc % 128 == 0 or tc == M):
            return tc
    return M


# ----------------------------------------------------------------------------
# Wrapper.
# ----------------------------------------------------------------------------
def conv_block_forward(x_nchw, weight_oihw, bias, gamma, beta, *,
                       eps=EPS, matmul_dtype=jnp.bfloat16,
                       intermediate_dtype=jnp.bfloat16, tile_rows=None):
    """ConvBlock forward (training-mode BN). x_nchw: (N, Cin, H, W) f32 -> (N, Cout, H, W) f32."""
    N, Cin, H, W = x_nchw.shape
    Cout = weight_oihw.shape[0]
    assert weight_oihw.shape == (Cout, Cin, KH, KW)

    in_bytes = jnp.dtype(matmul_dtype).itemsize
    inter_bytes = jnp.dtype(intermediate_dtype).itemsize

    # Generation-aware VMEM budget: ~3/4 of physical (96 MiB on v5e/v6e, 48 MiB on v7x).
    vmem_cap = _vmem_capacity_bytes()
    vmem_limit = int(min(max((vmem_cap * 3) // 4, 32 * 1024 * 1024), 100 * 1024 * 1024))

    if tile_rows is None:
        TH = _pick_tile_rows(H, W, Cin, Cout, in_bytes, inter_bytes, vmem_limit)
    else:
        TH = int(tile_rows)
        if H % TH != 0 or ((TH * W) % 128 != 0 and TH != H):
            TH = H                                    # full-extent rows: always legal
    GH = H // TH
    Hp, Wp = H + 2, W + 2

    # NCHW -> NHWC (+1 halo pad) in the matmul dtype (bf16 halves DMA bytes & VMEM).
    # TODO(synk): keep the model NHWC end-to-end to remove this extra HBM round trip.
    x_nhwc = jnp.transpose(x_nchw, (0, 2, 3, 1)).astype(matmul_dtype)
    x_pad = jnp.pad(x_nhwc, ((0, 0), (1, 1), (1, 1), (0, 0)))

    # (Cout, Cin, KH, KW) -> (9, Cout, Cin): one (Cout, Cin) weight matrix per tap.
    w_taps = jnp.transpose(weight_oihw, (2, 3, 0, 1)).reshape(KH * KW, Cout, Cin)
    w_taps = w_taps.astype(matmul_dtype)

    cparams1 = pltpu.CompilerParams(
        # batch "parallel" (megacore split on n), row axis "arbitrary" so a v7x core split
        # does not duplicate the resident padded-image DMA on both cores.
        dimension_semantics=("parallel", "arbitrary"),
        vmem_limit_bytes=vmem_limit)
    cparams2 = pltpu.CompilerParams(
        dimension_semantics=("parallel", "parallel"),
        vmem_limit_bytes=vmem_limit)

    y_flat, psum, psumsq = pl.pallas_call(
        _conv_stats_kernel,
        out_shape=(
            jax.ShapeDtypeStruct((N, Cout, H * W), intermediate_dtype),
            jax.ShapeDtypeStruct((N, GH, Cout, 1), jnp.float32),
            jax.ShapeDtypeStruct((N, GH, Cout, 1), jnp.float32),
        ),
        grid=(N, GH),
        in_specs=[
            # whole padded image per n; re-used (kept resident) across its row-blocks
            pl.BlockSpec((1, Hp, Wp, Cin), lambda n, h: (n, 0, 0, 0)),
            pl.BlockSpec((KH * KW, Cout, Cin), lambda n, h: (0, 0, 0)),
        ],
        out_specs=(
            pl.BlockSpec((1, Cout, TH * W), lambda n, h: (n, 0, h)),
            pl.BlockSpec((1, 1, Cout, 1), lambda n, h: (n, h, 0, 0)),
            pl.BlockSpec((1, 1, Cout, 1), lambda n, h: (n, h, 0, 0)),
        ),
        compiler_params=cparams1,
    )(x_pad, w_taps)

    # Combine the tiny per-tile partials Welford-style (all tiles have equal count).
    Mt = jnp.float32(TH * W)
    count = jnp.float32(N * H * W)
    psum2 = psum[..., 0]                                    # (N, GH, Cout)
    psq2 = psumsq[..., 0]                                   # (N, GH, Cout)
    ssum = jnp.sum(psum2, axis=(0, 1))                      # (Cout,)
    mean = ssum / count
    mu_t = psum2 / Mt
    m2 = jnp.sum(psq2, axis=(0, 1)) + Mt * jnp.sum((mu_t - mean) ** 2, axis=(0, 1))
    var = jnp.maximum(m2 / count, 0.0)                      # biased variance (BN semantics)
    inv_std = jax.lax.rsqrt(var + jnp.float32(eps))

    # NOTE: conv bias is intentionally unused: training-mode BN subtracts the batch mean,
    # so a constant per-channel bias cancels exactly.  (Must be re-applied if this block
    # is ever run with eval/running statistics.)
    del bias
    scale_c = gamma.astype(jnp.float32) * inv_std           # (Cout,)
    shift_c = beta.astype(jnp.float32) - mean * scale_c     # (Cout,)
    scale = scale_c.reshape(Cout, 1)
    shift = shift_c.reshape(Cout, 1)

    # Pass 2: pure streaming scale+shift+ReLU, tiled independently of the conv grid.
    M = H * W
    TC = _pick_tile_cols(M, Cout, vmem_limit)
    NC = M // TC

    out_flat = pl.pallas_call(
        _bn_relu_kernel,
        out_shape=jax.ShapeDtypeStruct((N, Cout, M), jnp.float32),
        grid=(N, NC),
        in_specs=[
            pl.BlockSpec((1, Cout, TC), lambda n, c: (n, 0, c)),
            pl.BlockSpec((Cout, 1), lambda n, c: (0, 0)),
            pl.BlockSpec((Cout, 1), lambda n, c: (0, 0)),
        ],
        out_specs=pl.BlockSpec((1, Cout, TC), lambda n, c: (n, 0, c)),
        compiler_params=cparams2,
    )(y_flat, scale, shift)

    # Free metadata reshape to NCHW (no XLA transpose needed).
    return out_flat.reshape(N, Cout, H, W)


# ----------------------------------------------------------------------------
# Pure-JAX reference (matches PyTorch ConvBlock.forward, training-mode BN).
# ----------------------------------------------------------------------------
def conv_block_reference(x_nchw, weight_oihw, bias, gamma, beta, eps=EPS):
    y = jax.lax.conv_general_dilated(
        x_nchw.astype(jnp.float32), weight_oihw.astype(jnp.float32),
        window_strides=(1, 1), padding="SAME",
        dimension_numbers=("NCHW", "OIHW", "NCHW"))
    y = y + bias[None, :, None, None]
    mean = jnp.mean(y, axis=(0, 2, 3), keepdims=True)
    var = jnp.mean((y - mean) ** 2, axis=(0, 2, 3), keepdims=True)
    y = (y - mean) * jax.lax.rsqrt(var + eps)
    y = y * gamma[None, :, None, None] + beta[None, :, None, None]
    return jnp.maximum(y, 0.0)


if __name__ == "__main__":
    # Small shapes consistent with the module.
    N, Cin, Cout, H, W = 2, 4, 8, 16, 16

    key = jax.random.PRNGKey(0)
    kx, kw, kb, kg, kbe = jax.random.split(key, 5)

    x = jax.random.normal(kx, (N, Cin, H, W), dtype=jnp.float32)

    fan_in = Cin * KH * KW
    bound = 1.0 / (fan_in ** 0.5)
    weight = jax.random.uniform(kw, (Cout, Cin, KH, KW), jnp.float32, -bound, bound)
    bias = jax.random.uniform(kb, (Cout,), jnp.float32, -bound, bound)
    gamma = jax.random.uniform(kg, (Cout,), jnp.float32, 0.5, 1.5)
    beta = jax.random.uniform(kbe, (Cout,), jnp.float32, -0.5, 0.5)

    out = conv_block_forward(x, weight, bias, gamma, beta)   # bf16 MXU + bf16 intermediate
    out = jax.block_until_ready(out)
    assert out.shape == (N, Cout, H, W)

    # Check 1: reference with conv inputs rounded to bf16 (exact products) — isolates
    # structural correctness; remaining error is the bf16 intermediate rounding.
    xb = x.astype(jnp.bfloat16).astype(jnp.float32)
    wb = weight.astype(jnp.bfloat16).astype(jnp.float32)
    ref_b = conv_block_reference(xb, wb, bias, gamma, beta)
    err_b = float(jnp.max(jnp.abs(out - ref_b)))
    assert err_b < 3e-2, err_b

    # Check 2: loose sanity vs the full-f32 reference (bf16 input + intermediate rounding).
    ref_f = conv_block_reference(x, weight, bias, gamma, beta)
    err_f = float(jnp.max(jnp.abs(out - ref_f)))
    assert err_f < 8e-2, err_f

    # Check 3: tiling invariance — force a 2-step row grid (tile_rows=8) and compare.
    out_t = jax.block_until_ready(
        conv_block_forward(x, weight, bias, gamma, beta, tile_rows=8))
    err_t = float(jnp.max(jnp.abs(out - out_t)))
    assert err_t < 1e-4, err_t

    print("KERNEL_OK")
</pallas_src>

<mosaic_0001>
module attributes {stable_mosaic.version = 11 : i64} {
  func.func @_conv_stats_kernel(%arg0: i32, %arg1: i32, %arg2: memref<1x18x18x4xbf16, #tpu.memory_space<vmem>>, %arg3: memref<9x8x4xbf16, #tpu.memory_space<vmem>>, %arg4: memref<1x8x256xbf16, #tpu.memory_space<vmem>>, %arg5: memref<1x1x8x1xf32, #tpu.memory_space<vmem>>, %arg6: memref<1x1x8x1xf32, #tpu.memory_space<vmem>>) attributes {dimension_semantics = [#tpu.dimension_semantics<parallel>, #tpu.dimension_semantics<arbitrary>], iteration_bounds = array<i64: 2, 1>, scalar_prefetch = 0 : i64, scratch_operands = 0 : i64, tpu.core_type = #tpu.core_type<tc>, window_params = [{transform_indices = @transform_0, window_bounds = array<i64: 1, 18, 18, 4>}, {pipeline_mode = #tpu.pipeline_mode<synchronous>, transform_indices = @transform_1, window_bounds = array<i64: 9, 8, 4>}, {transform_indices = @transform_2, window_bounds = array<i64: 1, 8, 256>}, {transform_indices = @transform_3, window_bounds = array<i64: 1, 1, 8, 1>}, {transform_indices = @transform_4, window_bounds = array<i64: 1, 1, 8, 1>}]} {
    %c16_i32 = arith.constant 16 : i32
    %0 = arith.muli %arg1, %c16_i32 : i32
    %1 = tpu.assume_multiple %0, 8 : i32
    %c0_i32 = arith.constant 0 : i32
    %2 = arith.addi %1, %c0_i32 : i32
    %c0 = arith.constant 0 : index
    %3 = arith.index_cast %2 : i32 to index
    %c0_0 = arith.constant 0 : index
    %c0_1 = arith.constant 0 : index
    %4 = vector.load %arg2[%c0, %3, %c0_0, %c0_1] : memref<1x18x18x4xbf16, #tpu.memory_space<vmem>>, vector<1x16x16x4xbf16>
    %5 = vector.shape_cast %4 : vector<1x16x16x4xbf16> to vector<16x16x4xbf16>
    %6 = vector.shape_cast %5 : vector<16x16x4xbf16> to vector<256x4xbf16>
    %c0_2 = arith.constant 0 : index
    %c0_3 = arith.constant 0 : index
    %c0_4 = arith.constant 0 : index
    %7 = vector.load %arg3[%c0_2, %c0_3, %c0_4] : memref<9x8x4xbf16, #tpu.memory_space<vmem>>, vector<1x8x4xbf16>
    %8 = vector.shape_cast %7 : vector<1x8x4xbf16> to vector<8x4xbf16>
    %cst = arith.constant dense<0.000000e+00> : vector<8x256xf32>
    %9 = tpu.matmul %8, %6, %cst {dimension_numbers = #tpu.dot_dimension_numbers<[1], [1], [0], [0], [0, 0, 1, 0], [], []>} : vector<8x4xbf16>, vector<256x4xbf16>, vector<8x256xf32> -> vector<8x256xf32>
    %c0_i32_5 = arith.constant 0 : i32
    %10 = arith.addi %1, %c0_i32_5 : i32
    %c0_6 = arith.constant 0 : index
    %11 = arith.index_cast %10 : i32 to index
    %c1 = arith.constant 1 : index
    %c0_7 = arith.constant 0 : index
    %12 = vector.load %arg2[%c0_6, %11, %c1, %c0_7] : memref<1x18x18x4xbf16, #tpu.memory_space<vmem>>, vector<1x16x16x4xbf16>
    %13 = vector.shape_cast %12 : vector<1x16x16x4xbf16> to vector<16x16x4xbf16>
    %14 = vector.shape_cast %13 : vector<16x16x4xbf16> to vector<256x4xbf16>
    %c1_8 = arith.constant 1 : index
    %c0_9 = arith.constant 0 : index
    %c0_10 = arith.constant 0 : index
    %15 = vector.load %arg3[%c1_8, %c0_9, %c0_10] : memref<9x8x4xbf16, #tpu.memory_space<vmem>>, vector<1x8x4xbf16>
    %16 = vector.shape_cast %15 : vector<1x8x4xbf16> to vector<8x4xbf16>
    %cst_11 = arith.constant dense<0.000000e+00> : vector<8x256xf32>
    %17 = tpu.matmul %16, %14, %cst_11 {dimension_numbers = #tpu.dot_dimension_numbers<[1], [1], [0], [0], [0, 0, 1, 0], [], []>} : vector<8x4xbf16>, vector<256x4xbf16>, vector<8x256xf32> -> vector<8x256xf32>
    %18 = arith.addf %9, %17 : vector<8x256xf32>
    %c0_i32_12 = arith.constant 0 : i32
    %19 = arith.addi %1, %c0_i32_12 : i32
    %c0_13 = arith.constant 0 : index
    %20 = arith.index_cast %19 : i32 to index
    %c2 = arith.constant 2 : index
    %c0_14 = arith.constant 0 : index
    %21 = vector.load %arg2[%c0_13, %20, %c2, %c0_14] : memref<1x18x18x4xbf16, #tpu.memory_space<vmem>>, vector<1x16x16x4xbf16>
    %22 = vector.shape_cast %21 : vector<1x16x16x4xbf16> to vector<16x16x4xbf16>
    %23 = vector.shape_cast %22 : vector<16x16x4xbf16> to vector<256x4xbf16>
    %c2_15 = arith.constant 2 : index
    %c0_16 = arith.constant 0 : index
    %c0_17 = arith.constant 0 : index
    %24 = vector.load %arg3[%c2_15, %c0_16, %c0_17] : memref<9x8x4xbf16, #tpu.memory_space<vmem>>, vector<1x8x4xbf16>
    %25 = vector.shape_cast %24 : vector<1x8x4xbf16> to vector<8x4xbf16>
    %cst_18 = arith.constant dense<0.000000e+00> : vector<8x256xf32>
    %26 = tpu.matmul %25, %23, %cst_18 {dimension_numbers = #tpu.dot_dimension_numbers<[1], [1], [0], [0], [0, 0, 1, 0], [], []>} : vector<8x4xbf16>, vector<256x4xbf16>, vector<8x256xf32> -> vector<8x256xf32>
    %27 = arith.addf %18, %26 : vector<8x256xf32>
    %c1_i32 = arith.constant 1 : i32
    %28 = arith.addi %1, %c1_i32 : i32
    %c0_19 = arith.constant 0 : index
    %29 = arith.index_cast %28 : i32 to index
    %c0_20 = arith.constant 0 : index
    %c0_21 = arith.constant 0 : index
    %30 = vector.load %arg2[%c0_19, %29, %c0_20, %c0_21] : memref<1x18x18x4xbf16, #tpu.memory_space<vmem>>, vector<1x16x16x4xbf16>
    %31 = vector.shape_cast %30 : vector<1x16x16x4xbf16> to vector<16x16x4xbf16>
    %32 = vector.shape_cast %31 : vector<16x16x4xbf16> to vector<256x4xbf16>
    %c3 = arith.constant 3 : index
    %c0_22 = arith.constant 0 : index
    %c0_23 = arith.constant 0 : index
    %33 = vector.load %arg3[%c3, %c0_22, %c0_23] : memref<9x8x4xbf16, #tpu.memory_space<vmem>>, vector<1x8x4xbf16>
    %34 = vector.shape_cast %33 : vector<1x8x4xbf16> to vector<8x4xbf16>
    %cst_24 = arith.constant dense<0.000000e+00> : vector<8x256xf32>
    %35 = tpu.matmul %34, %32, %cst_24 {dimension_numbers = #tpu.dot_dimension_numbers<[1], [1], [0], [0], [0, 0, 1, 0], [], []>} : vector<8x4xbf16>, vector<256x4xbf16>, vector<8x256xf32> -> vector<8x256xf32>
    %36 = arith.addf %27, %35 : vector<8x256xf32>
    %c1_i32_25 = arith.constant 1 : i32
    %37 = arith.addi %1, %c1_i32_25 : i32
    %c0_26 = arith.constant 0 : index
    %38 = arith.index_cast %37 : i32 to index
    %c1_27 = arith.constant 1 : index
    %c0_28 = arith.constant 0 : index
    %39 = vector.load %arg2[%c0_26, %38, %c1_27, %c0_28] : memref<1x18x18x4xbf16, #tpu.memory_space<vmem>>, vector<1x16x16x4xbf16>
    %40 = vector.shape_cast %39 : vector<1x16x16x4xbf16> to vector<16x16x4xbf16>
    %41 = vector.shape_cast %40 : vector<16x16x4xbf16> to vector<256x4xbf16>
    %c4 = arith.constant 4 : index
    %c0_29 = arith.constant 0 : index
    %c0_30 = arith.constant 0 : index
    %42 = vector.load %arg3[%c4, %c0_29, %c0_30] : memref<9x8x4xbf16, #tpu.memory_space<vmem>>, vector<1x8x4xbf16>
    %43 = vector.shape_cast %42 : vector<1x8x4xbf16> to vector<8x4xbf16>
    %cst_31 = arith.constant dense<0.000000e+00> : vector<8x256xf32>
    %44 = tpu.matmul %43, %41, %cst_31 {dimension_numbers = #tpu.dot_dimension_numbers<[1], [1], [0], [0], [0, 0, 1, 0], [], []>} : vector<8x4xbf16>, vector<256x4xbf16>, vector<8x256xf32> -> vector<8x256xf32>
    %45 = arith.addf %36, %44 : vector<8x256xf32>
    %c1_i32_32 = arith.constant 1 : i32
    %46 = arith.addi %1, %c1_i32_32 : i32
    %c0_33 = arith.constant 0 : index
    %47 = arith.index_cast %46 : i32 to index
    %c2_34 = arith.constant 2 : index
    %c0_35 = arith.constant 0 : index
    %48 = vector.load %arg2[%c0_33, %47, %c2_34, %c0_35] : memref<1x18x18x4xbf16, #tpu.memory_space<vmem>>, vector<1x16x16x4xbf16>
    %49 = vector.shape_cast %48 : vector<1x16x16x4xbf16> to vector<16x16x4xbf16>
    %50 = vector.shape_cast %49 : vector<16x16x4xbf16> to vector<256x4xbf16>
    %c5 = arith.constant 5 : index
    %c0_36 = arith.constant 0 : index
    %c0_37 = arith.constant 0 : index
    %51 = vector.load %arg3[%c5, %c0_36, %c0_37] : memref<9x8x4xbf16, #tpu.memory_space<vmem>>, vector<1x8x4xbf16>
    %52 = vector.shape_cast %51 : vector<1x8x4xbf16> to vector<8x4xbf16>
    %cst_38 = arith.constant dense<0.000000e+00> : vector<8x256xf32>
    %53 = tpu.matmul %52, %50, %cst_38 {dimension_numbers = #tpu.dot_dimension_numbers<[1], [1], [0], [0], [0, 0, 1, 0], [], []>} : vector<8x4xbf16>, vector<256x4xbf16>, vector<8x256xf32> -> vector<8x256xf32>
    %54 = arith.addf %45, %53 : vector<8x256xf32>
    %c2_i32 = arith.constant 2 : i32
    %55 = arith.addi %1, %c2_i32 : i32
    %c0_39 = arith.constant 0 : index
    %56 = arith.index_cast %55 : i32 to index
    %c0_40 = arith.constant 0 : index
    %c0_41 = arith.constant 0 : index
    %57 = vector.load %arg2[%c0_39, %56, %c0_40, %c0_41] : memref<1x18x18x4xbf16, #tpu.memory_space<vmem>>, vector<1x16x16x4xbf16>
    %58 = vector.shape_cast %57 : vector<1x16x16x4xbf16> to vector<16x16x4xbf16>
    %59 = vector.shape_cast %58 : vector<16x16x4xbf16> to vector<256x4xbf16>
    %c6 = arith.constant 6 : index
    %c0_42 = arith.constant 0 : index
    %c0_43 = arith.constant 0 : index
    %60 = vector.load %arg3[%c6, %c0_42, %c0_43] : memref<9x8x4xbf16, #tpu.memory_space<vmem>>, vector<1x8x4xbf16>
    %61 = vector.shape_cast %60 : vector<1x8x4xbf16> to vector<8x4xbf16>
    %cst_44 = arith.constant dense<0.000000e+00> : vector<8x256xf32>
    %62 = tpu.matmul %61, %59, %cst_44 {dimension_numbers = #tpu.dot_dimension_numbers<[1], [1], [0], [0], [0, 0, 1, 0], [], []>} : vector<8x4xbf16>, vector<256x4xbf16>, vector<8x256xf32> -> vector<8x256xf32>
    %63 = arith.addf %54, %62 : vector<8x256xf32>
    %c2_i32_45 = arith.constant 2 : i32
    %64 = arith.addi %1, %c2_i32_45 : i32
    %c0_46 = arith.constant 0 : index
    %65 = arith.index_cast %64 : i32 to index
    %c1_47 = arith.constant 1 : index
    %c0_48 = arith.constant 0 : index
    %66 = vector.load %arg2[%c0_46, %65, %c1_47, %c0_48] : memref<1x18x18x4xbf16, #tpu.memory_space<vmem>>, vector<1x16x16x4xbf16>
    %67 = vector.shape_cast %66 : vector<1x16x16x4xbf16> to vector<16x16x4xbf16>
    %68 = vector.shape_cast %67 : vector<16x16x4xbf16> to vector<256x4xbf16>
    %c7 = arith.constant 7 : index
    %c0_49 = arith.constant 0 : index
    %c0_50 = arith.constant 0 : index
    %69 = vector.load %arg3[%c7, %c0_49, %c0_50] : memref<9x8x4xbf16, #tpu.memory_space<vmem>>, vector<1x8x4xbf16>
    %70 = vector.shape_cast %69 : vector<1x8x4xbf16> to vector<8x4xbf16>
    %cst_51 = arith.constant dense<0.000000e+00> : vector<8x256xf32>
    %71 = tpu.matmul %70, %68, %cst_51 {dimension_numbers = #tpu.dot_dimension_numbers<[1], [1], [0], [0], [0, 0, 1, 0], [], []>} : vector<8x4xbf16>, vector<256x4xbf16>, vector<8x256xf32> -> vector<8x256xf32>
    %72 = arith.addf %63, %71 : vector<8x256xf32>
    %c2_i32_52 = arith.constant 2 : i32
    %73 = arith.addi %1, %c2_i32_52 : i32
    %c0_53 = arith.constant 0 : index
    %74 = arith.index_cast %73 : i32 to index
    %c2_54 = arith.constant 2 : index
    %c0_55 = arith.constant 0 : index
    %75 = vector.load %arg2[%c0_53, %74, %c2_54, %c0_55] : memref<1x18x18x4xbf16, #tpu.memory_space<vmem>>, vector<1x16x16x4xbf16>
    %76 = vector.shape_cast %75 : vector<1x16x16x4xbf16> to vector<16x16x4xbf16>
    %77 = vector.shape_cast %76 : vector<16x16x4xbf16> to vector<256x4xbf16>
    %c8 = arith.constant 8 : index
    %c0_56 = arith.constant 0 : index
    %c0_57 = arith.constant 0 : index
    %78 = vector.load %arg3[%c8, %c0_56, %c0_57] : memref<9x8x4xbf16, #tpu.memory_space<vmem>>, vector<1x8x4xbf16>
    %79 = vector.shape_cast %78 : vector<1x8x4xbf16> to vector<8x4xbf16>
    %cst_58 = arith.constant dense<0.000000e+00> : vector<8x256xf32>
    %80 = tpu.matmul %79, %77, %cst_58 {dimension_numbers = #tpu.dot_dimension_numbers<[1], [1], [0], [0], [0, 0, 1, 0], [], []>} : vector<8x4xbf16>, vector<256x4xbf16>, vector<8x256xf32> -> vector<8x256xf32>
    %81 = arith.addf %72, %80 : vector<8x256xf32>
    %cst_59 = arith.constant dense<0.000000e+00> : vector<8xf32>
    %82 = vector.multi_reduction <add>, %81, %cst_59 [1] : vector<8x256xf32> to vector<8xf32>
    %83 = vector.shape_cast %82 : vector<8xf32> to vector<8x1xf32>
    %cst_60 = arith.constant 3.906250e-03 : f32
    %84 = vector.broadcast %cst_60 : f32 to vector<8x1xf32>
    %85 = arith.mulf %83, %84 : vector<8x1xf32>
    %86 = vector.broadcast %85 : vector<8x1xf32> to vector<8x256xf32>
    %87 = arith.subf %81, %86 : vector<8x256xf32>
    %c0_61 = arith.constant 0 : index
    %c0_62 = arith.constant 0 : index
    %c0_63 = arith.constant 0 : index
    %c0_64 = arith.constant 0 : index
    %88 = vector.load %arg5[%c0_61, %c0_62, %c0_63, %c0_64] : memref<1x1x8x1xf32, #tpu.memory_space<vmem>>, vector<1x1x8x1xf32>
    %89 = vector.shape_cast %88 : vector<1x1x8x1xf32> to vector<8x1xf32>
    %90 = vector.shape_cast %83 : vector<8x1xf32> to vector<1x1x8x1xf32>
    tpu.vector_store %arg5[%c0_61, %c0_62, %c0_63, %c0_64], %90 {strides = array<i32>} : memref<1x1x8x1xf32, #tpu.memory_space<vmem>>, vector<1x1x8x1xf32>,
    %91 = arith.mulf %87, %87 : vector<8x256xf32>
    %cst_65 = arith.constant dense<0.000000e+00> : vector<8xf32>
    %92 = vector.multi_reduction <add>, %91, %cst_65 [1] : vector<8x256xf32> to vector<8xf32>
    %93 = vector.shape_cast %92 : vector<8xf32> to vector<8x1xf32>
    %c0_66 = arith.constant 0 : index
    %c0_67 = arith.constant 0 : index
    %c0_68 = arith.constant 0 : index
    %c0_69 = arith.constant 0 : index
    %94 = vector.load %arg6[%c0_66, %c0_67, %c0_68, %c0_69] : memref<1x1x8x1xf32, #tpu.memory_space<vmem>>, vector<1x1x8x1xf32>
    %95 = vector.shape_cast %94 : vector<1x1x8x1xf32> to vector<8x1xf32>
    %96 = vector.shape_cast %93 : vector<8x1xf32> to vector<1x1x8x1xf32>
    tpu.vector_store %arg6[%c0_66, %c0_67, %c0_68, %c0_69], %96 {strides = array<i32>} : memref<1x1x8x1xf32, #tpu.memory_space<vmem>>, vector<1x1x8x1xf32>,
    %97 = arith.truncf %81 : vector<8x256xf32> to vector<8x256xbf16>
    %c0_70 = arith.constant 0 : index
    %c0_71 = arith.constant 0 : index
    %c0_72 = arith.constant 0 : index
    %98 = vector.load %arg4[%c0_70, %c0_71, %c0_72] : memref<1x8x256xbf16, #tpu.memory_space<vmem>>, vector<1x8x256xbf16>
    %99 = vector.shape_cast %98 : vector<1x8x256xbf16> to vector<8x256xbf16>
    %100 = vector.shape_cast %97 : vector<8x256xbf16> to vector<1x8x256xbf16>
    tpu.vector_store %arg4[%c0_70, %c0_71, %c0_72], %100 {strides = array<i32>} : memref<1x8x256xbf16, #tpu.memory_space<vmem>>, vector<1x8x256xbf16>,
    return
  }
  func.func @transform_0(%arg0: i32, %arg1: i32) -> (i32, i32, i32, i32) {
    %c0_i32 = arith.constant 0 : i32
    %c0_i32_0 = arith.constant 0 : i32
    %c0_i32_1 = arith.constant 0 : i32
    %c0_i32_2 = arith.constant 0 : i32
    return %arg0, %c0_i32, %c0_i32_0, %c0_i32_1 : i32, i32, i32, i32
  }
  func.func @transform_1(%arg0: i32, %arg1: i32) -> (i32, i32, i32) {
    %c0_i32 = arith.constant 0 : i32
    %c0_i32_0 = arith.constant 0 : i32
    %c0_i32_1 = arith.constant 0 : i32
    %c0_i32_2 = arith.constant 0 : i32
    return %c0_i32, %c0_i32_0, %c0_i32_1 : i32, i32, i32
  }
  func.func @transform_2(%arg0: i32, %arg1: i32) -> (i32, i32, i32) {
    %c0_i32 = arith.constant 0 : i32
    %c0_i32_0 = arith.constant 0 : i32
    return %arg0, %c0_i32, %arg1 : i32, i32, i32
  }
  func.func @transform_3(%arg0: i32, %arg1: i32) -> (i32, i32, i32, i32) {
    %c0_i32 = arith.constant 0 : i32
    %c0_i32_0 = arith.constant 0 : i32
    %c0_i32_1 = arith.constant 0 : i32
    return %arg0, %arg1, %c0_i32, %c0_i32_0 : i32, i32, i32, i32
  }
  func.func @transform_4(%arg0: i32, %arg1: i32) -> (i32, i32, i32, i32) {
    %c0_i32 = arith.constant 0 : i32
    %c0_i32_0 = arith.constant 0 : i32
    %c0_i32_1 = arith.constant 0 : i32
    return %arg0, %arg1, %c0_i32, %c0_i32_0 : i32, i32, i32, i32
  }
}

</mosaic_0001>

<bundles_post_ra>
// kernel: tpu_custom_call.1
= control target key start
LH: loop header
LB: loop body
LE: loop exit
PB: predicated region body
PF: predicated region fallthrough
CT: control target
= control target key end

     0   :  { %10 = vsyncpa [#allocation3], 0  ;;  %s6107_s0 = inlined_call_operand.vmem [shape: bf16[2,18,18,4], index: 0, kind: input, shape index: {}]   ;;  %s6108_s1 = inlined_call_operand.vmem [shape: bf16[9,8,4], index: 1, kind: input, shape index: {}]   ;;  %s6109_s2 = inlined_call_operand.hbm [shape: bf16[2,8,256], index: 2, kind: output, shape index: {0}]   ;;  %s6110_s3 = inlined_call_operand.vmem [shape: f32[2,1,8,1], index: 3, kind: output, shape index: {1}]   ;;  %s6111_s4 = inlined_call_operand.vmem [shape: f32[2,1,8,1], index: 4, kind: output, shape index: {2}]  }
   0x1   :  { %12 = vsyncpa [#allocation3 + $0x1], 0  ;;  %s4589_s15 = smov 0   ;;  %s4591_s16 = smov 0  }
   0x2   :  { %s4593_s17 = smov 0   ;;  %s4595_s18 = smov 0  }
   0x3   :  { %s4597_s19 = smov 0   ;;  %s4599_s20 = smov 0  }
   0x4 LB: > { %s3729_s21 = sadd.s32 4294967295, %s4561_s20   ;;  %s3730_s22 = sadd.s32 4294967294, %s4561_s20   ;;  %s4561_s20 = sphi %s4599_s20, %s18_s20   ;;  %s4557_s19 = sphi %s4597_s19, %s6122_s19   ;;  %s4553_s18 = sphi %s4595_s18, %s6121_s18   ;;  %s4549_s17 = sphi %s4593_s17, %s6120_s17   ;;  %s4545_s16 = sphi %s4591_s16, %s6119_s16   ;;  %s4541_s15 = sphi %s4589_s15, %s6118_s15  }
   0x5   : > { %s30_s23 = sadd.s32 1, %s4557_s19  ;;  %s86_s24 = sadd.s32 1, %s4549_s17 }
   0x6   : > { %p32_p0 = scmp.ge.s32.totalorder %s30_s23, 2  ;;  %p96_p1 = scmp.ne.s32.totalorder %s4549_s17, %s4545_s16 }
   0x7   : > { %p97_p2 = scmp.eq.s32.totalorder %s3729_s21, 1  ;;  %p102_p3 = scmp.ne.s32.totalorder %s4545_s16, %s4541_s15 }
   0x8   : > { %s6124_s23 = smov (%p32_p0, %s30_s23), 0  ;;  %p103_p5 = scmp.eq.s32.totalorder %s3730_s22, 1 }
   0x9   : > { %p4629_p4 = por %p97_p2, %p96_p1  ;;  %s81_s26 = ssub.s32 %s4557_s19, %s6124_s23 }
   0xa   : > { %p3733_p6 = scmp.ge.s32.totalorder %s4561_s20, 1  ;;  %p84_p7 = scmp.eq.s32.totalorder %s81_s26, 0 }
   0xb   : > { %p4636_p8 = por %p103_p5, %p102_p3  ;;  %p188_p9 = scmp.lt.s32.totalorder %s4561_s20, 3 }
   0xc   : > { %s4642_s28 = scalar_select %p84_p7, %s4549_s17, %s86_s24  }
   0xd   : > { %p189_p10 = pnand %p3733_p6, %p188_p9 }
   0xe   : > { %p228_p11 = scmp.lt.s32.totalorder (!%p189_p10), %s4553_s18, 1  ;;  %s4146_s26 = sshll.u32 (!%p189_p10), %s4553_s18, 7 }
   0xf   : > { %192 = sbr.rel (%p189_p10) target bundleno = 862 (0x35e), region = 28  ;;  %s3579_s5 = scalar_lea.hbm (!%p189_p10), %s6109_s2, %s4146_s26 }
  0x10   : > { %s4563_s10 = smov (!%p189_p10), [#allocation2]  }
  0x14   : > { %vm739_vm0 = vcmask 31744   ;;  %v4648_v0 = vld [vmem:[%s6108_s1 + $0x4] sm:$0xf]  ;;  %v4653_v1 = vld [vmem:[%s6108_s1] sm:$0xf]  ;;  %s4656_s7 = scalar_select %p228_p11, %s4553_s18, 1 }
  0x15   : > { %4163 = vmatprep.mubr.msk.bf16.mxu0 %vm739_vm0, %v4648_v0  ;;  %4181 = vmatprep.mubr.msk.bf16.mxu1 %vm739_vm0, %v4653_v1  ;;  %vm302_vm1 = vsmask.f32 3328  ;;  %vm303_vm2 = vsmask.f32 7440  ;;  %vm1052_vm4 = vcmask 1042432   ;;  %vm1053_vm5 = vcmask 1046532  }
  0x16   : > { %s4381_s8 = smul.u32 216, %s4656_s7  ;;  %vm4694_vm3 = vmor %vm302_vm1, %vm303_vm2  ;;  %s3736_s14 = sshll.u32 %s4656_s7, 3  ;;  %vm3533_vm7 = vcmask 7168  }
  0x17   : > { %vm4947_vm6 = vmor %vm1052_vm4, %vm1053_vm5  ;;  %s240_s24 = scalar_lea.vmem %s6110_s3, %s3736_s14 }
  0x18   : > { %s4666_s11 = scalar_lea.vmem %s6107_s0, %s4381_s8 }
  0x19   : > { %v283_v2 = vld [vmem:[%s4666_s11 + $0xb4] sm:$0xf]  ;;  %v4670_v3 = vld [vmem:[%s4666_s11 + $0xb8] sm:$0xf]  ;;  %v4673_v4 = vld [vmem:[%s4666_s11 + $0xbc] sm:$0x1] }
  0x1a   : > { %v666_v5 = vshrl.u32 %v283_v2, 16  ;;  %v669_v6 = vshll.u32 %v283_v2, 16  ;;  %v675_v7 = vshll.u32 %v4670_v3, 16  ;;  %v679_v8 = vshrl.u32 %v4670_v3, 16  ;;  %v267_v9 = vld [vmem:[%s4666_s11 + $0x54] sm:$0xf] }
  0x1b   : > { %v685_v10 = vshll.u32 %v4673_v4, 16  ;;  %v1165_v11 = vrot.slane %v4673_v4, 5  ;;  %v3771_v12 = vcombine.low %v283_v2, %v4670_v3  ;;  %v4682_v13 = vld [vmem:[%s4666_s11 + $0x58] sm:$0xf]  ;;  %v4685_v14 = vld [vmem:[%s4666_s11 + $0x5c] sm:$0x1] }
  0x1c   : > { %v668_v15 = vrot.slane %v666_v5, 4  ;;  %v671_v16 = vrot.slane %v669_v6, 5  ;;  %v677_v17 = vrot.slane %v675_v7, 5  ;;  %v681_v18 = vrot.slane %v679_v8, 4  ;;  %v281_v27 = vld [vmem:[%s4666_s11 + $0xa8] sm:$0xf] }
  0x1d   : > { %v687_v19 = vrot.slane %v685_v10, 5  ;;  %4317 = vmatprep.subr.msk.bf16.mxu1 %vm739_vm0, %v3771_v12  ;;  %v474_v20 = vshrl.u32 %v267_v9, 16  ;;  %v477_v21 = vshll.u32 %v267_v9, 16  ;;  %v483_v22 = vshll.u32 %v4682_v13, 16  ;;  %v4700_v33 = vld [vmem:[%s4666_s11 + $0xac] sm:$0xf] }
  0x1e   : > { %v672_v23 = vor.u32 %v671_v16, %v668_v15  ;;  %v682_v24 = vor.u32 %v681_v18, %v677_v17  ;;  %v487_v25 = vshrl.u32 %v4682_v13, 16  ;;  %v493_v26 = vshll.u32 %v4685_v14, 16  ;;  %v4708_v45 = vld [vmem:[%s4666_s11 + $0xb0] sm:$0x1]  ;;  %v265_v47 = vld [vmem:[%s4666_s11 + $0x48] sm:$0xf] }
  0x1f   : > { %v476_v29 = vrot.slane %v474_v20, 4  ;;  %v479_v30 = vrot.slane %v477_v21, 5  ;;  %v485_v31 = vrot.slane %v483_v22, 5  ;;  %v1109_v32 = vrot.slane %v4685_v14, 5  ;;  %v4715_v56 = vld [vmem:[%s4666_s11 + $0x4c] sm:$0xf] }
  0x20   : > { %v673_v34 = vrot.slane %v672_v23, 4  ;;  %v683_v35 = vrot.slane %v682_v24, 4  ;;  %v489_v36 = vrot.slane %v487_v25, 4  ;;  %v495_v37 = vrot.slane %v493_v26, 5  ;;  %v4725_v2 = vld [vmem:[%s4666_s11 + $0x50] sm:$0x1] }
  0x21   : > { %v480_v38 = vor.u32 %v479_v30, %v476_v29  ;;  %v3763_v39 = vcombine.low %v267_v9, %v4682_v13  ;;  %v642_v40 = vshrl.u32 %v281_v27, 16  ;;  %v645_v41 = vshll.u32 %v281_v27, 16  ;;  %v4735_v22 = vld [vmem:[%s4666_s11 + $0xa0] sm:$0xf]  ;;  %v4741_v30 = vld [vmem:[%s4666_s11 + $0xa4] sm:$0x1] }
  0x22   : > { %v678_v42 = vsel %vm4694_vm3, %v673_v34, %v677_v17  ;;  %v688_v43 = vsel %vm4694_vm3, %v683_v35, %v687_v19  ;;  %v490_v44 = vor.u32 %v489_v36, %v485_v31  ;;  %v651_v46 = vshll.u32 %v4700_v33, 16  ;;  %v279_v17 = vld [vmem:[%s4666_s11 + $0x9c] sm:$0xf]  ;;  %v4992_v14 = vld [vmem:[%s6108_s1 + $0xc] sm:$0xf] }
  0x23   : > { %v3754_v48 = vcombine.low %v678_v42, %v688_v43  ;;  %v481_v49 = vrot.slane %v480_v38, 4  ;;  %v937_v50 = vsel %vm739_vm0, %v3763_v39, 0  ;;  %v644_v51 = vrot.slane %v642_v40, 4  ;;  %v263_v39 = vld [vmem:[%s4666_s11 + $0x3c] sm:$0xf] }
  0x24   : > { %v491_v52 = vrot.slane %v490_v44, 4  ;;  %4166 = vmatpush3.bf16.xpose.msra.mxu1 %v937_v50  ;;  %v647_v53 = vrot.slane %v645_v41, 5  ;;  %v653_v54 = vrot.slane %v651_v46, 5  ;;  %v655_v55 = vshrl.u32 %v4700_v33, 16  ;;  %v4749_v44 = vld [vmem:[%s4666_s11 + $0x40] sm:$0xf] }
  0x25   : > { %4309 = vmatprep.subr.msk.bf16.mxu0 %vm739_vm0, %v3754_v48  ;;  %v486_v57 = vsel %vm4694_vm3, %v481_v49, %v485_v31  ;;  %v661_v58 = vshll.u32 %v4708_v45, 16  ;;  %v3770_v59 = vcombine.low %v281_v27, %v4700_v33  ;;  %v450_v60 = vshrl.u32 %v265_v47, 16  ;;  %v1009_v4 = vld [vmem:[%s4666_s11 + $0x3c] sm:$0xe] }
  0x26   : > { %v496_v61 = vsel %vm4694_vm3, %v491_v52, %v495_v37  ;;  %v648_v62 = vor.u32 %v647_v53, %v644_v51  ;;  %v657_v63 = vrot.slane %v655_v55, 4  ;;  %v453_v5 = vshll.u32 %v265_v47, 16  ;;  %v4757_v53 = vld [vmem:[%s4666_s11 + $0x44] sm:$0x1] }
  0x27   : > { %v3746_v6 = vcombine.low %v486_v57, %v496_v61  ;;  %v663_v7 = vrot.slane %v661_v58, 5  ;;  %4318 = vmatprep.subr.msk.bf16.mxu1 %vm739_vm0, %v3770_v59  ;;  %v452_v8 = vrot.slane %v450_v60, 4  ;;  %v459_v9 = vshll.u32 %v4715_v56, 16 }
  0x28   : > { %v649_v10 = vrot.slane %v648_v62, 4  ;;  %v658_v12 = vor.u32 %v657_v63, %v653_v54  ;;  %v455_v15 = vrot.slane %v453_v5, 5  ;;  %v463_v16 = vshrl.u32 %v4715_v56, 16  ;;  %v277_v5 = vld [vmem:[%s4666_s11 + $0x90] sm:$0xf] }
  0x29   : > { %v765_v18 = vsel %vm739_vm0, %v3746_v6, 0  ;;  %v461_v19 = vrot.slane %v459_v9, 5  ;;  %v469_v20 = vshll.u32 %v4725_v2, 16  ;;  %v3762_v21 = vcombine.low %v265_v47, %v4715_v56 }
  0x2a   : > { %4148 = vmatpush3.bf16.xpose.msra.mxu0 %v765_v18  ;;  %v654_v23 = vsel %vm4694_vm3, %v649_v10, %v653_v54  ;;  %v659_v24 = vrot.slane %v658_v12, 4  ;;  %v456_v25 = vor.u32 %v455_v15, %v452_v8  ;;  %v465_v26 = vrot.slane %v463_v16, 4  ;;  %v4767_v10 = vld [vmem:[%s4666_s11 + $0x94] sm:$0xf] }
  0x2b   : > { %v471_v27 = vrot.slane %v469_v20, 5  ;;  %v934_v29 = vsel %vm739_vm0, %v3762_v21, 0  ;;  %v618_v31 = vshrl.u32 %v279_v17, 16  ;;  %v621_v34 = vshll.u32 %v279_v17, 16  ;;  %v4774_v21 = vld [vmem:[%s4666_s11 + $0x98] sm:$0x1] }
  0x2c   : > { %v664_v35 = vsel %vm4694_vm3, %v659_v24, %v663_v7  ;;  %v457_v36 = vrot.slane %v456_v25, 4  ;;  %v466_v37 = vor.u32 %v465_v26, %v461_v19  ;;  %4168 = vmatpush3.bf16.xpose.msra.mxu1 %v934_v29  ;;  %v627_v38 = vshll.u32 %v4735_v22, 16  ;;  %v261_v29 = vld [vmem:[%s4666_s11 + $0x30] sm:$0xf] }
  0x2d   : > { %v3753_v40 = vcombine.low %v654_v23, %v664_v35  ;;  %v620_v41 = vrot.slane %v618_v31, 4  ;;  %v623_v42 = vrot.slane %v621_v34, 5  ;;  %v631_v43 = vshrl.u32 %v4735_v22, 16 }
  0x2e   : > { %v462_v46 = vsel %vm4694_vm3, %v457_v36, %v461_v19  ;;  %v467_v47 = vrot.slane %v466_v37, 4  ;;  %v629_v48 = vrot.slane %v627_v38, 5  ;;  %v637_v49 = vshll.u32 %v4741_v30, 16 }
  0x2f   : > { %4310 = vmatprep.subr.msk.bf16.mxu0 %vm739_vm0, %v3753_v40  ;;  %v624_v50 = vor.u32 %v623_v42, %v620_v41  ;;  %v633_v51 = vrot.slane %v631_v43, 4  ;;  %v3769_v52 = vcombine.low %v279_v17, %v4735_v22  ;;  %v426_v54 = vshrl.u32 %v263_v39, 16  ;;  %v4784_v41 = vld [vmem:[%s4666_s11 + $0x34] sm:$0xf] }
  0x30   : > { %v472_v55 = vsel %vm4694_vm3, %v467_v47, %v471_v27  ;;  %v639_v57 = vrot.slane %v637_v49, 5  ;;  %v429_v58 = vshll.u32 %v263_v39, 16  ;;  %v435_v59 = vshll.u32 %v4749_v44, 16 }
  0x31   : > { %v3745_v60 = vcombine.low %v462_v46, %v472_v55  ;;  %v625_v61 = vrot.slane %v624_v50, 4  ;;  %v634_v62 = vor.u32 %v633_v51, %v629_v48  ;;  %4319 = vmatprep.subr.msk.bf16.mxu1 %vm739_vm0, %v3769_v52  ;;  %v428_v63 = vrot.slane %v426_v54, 4  ;;  %v4791_v51 = vld [vmem:[%s4666_s11 + $0x38] sm:$0x1] }
  0x32   : > { %v431_v6 = vrot.slane %v429_v58, 5  ;;  %v437_v7 = vrot.slane %v435_v59, 5  ;;  %v439_v8 = vshrl.u32 %v4749_v44, 16  ;;  %v445_v9 = vshll.u32 %v4757_v53, 16  ;;  %v275_v59 = vld [vmem:[%s4666_s11 + $0x84] sm:$0xf] }
  0x33   : > { %v762_v12 = vsel %vm739_vm0, %v3745_v60, 0  ;;  %v630_v15 = vsel %vm4694_vm3, %v625_v61, %v629_v48  ;;  %v635_v16 = vrot.slane %v634_v62, 4  ;;  %v3761_v17 = vcombine.low %v263_v39, %v4749_v44 }
  0x34   : > { %4150 = vmatpush3.bf16.xpose.msra.mxu0 %v762_v12  ;;  %v432_v18 = vor.u32 %v431_v6, %v428_v63  ;;  %v441_v19 = vrot.slane %v439_v8, 4  ;;  %v447_v20 = vrot.slane %v445_v9, 5  ;;  %v594_v23 = vshrl.u32 %v277_v5, 16  ;;  %v4805_v12 = vld [vmem:[%s4666_s11 + $0x8c] sm:$0x1] }
  0x35   : > { %v640_v24 = vsel %vm4694_vm3, %v635_v16, %v639_v57  ;;  %v931_v25 = vsel %vm739_vm0, %v3761_v17, 0  ;;  %v597_v26 = vshll.u32 %v277_v5, 16  ;;  %v603_v27 = vshll.u32 %v4767_v10, 16 }
  0x36   : > { %v3752_v31 = vcombine.low %v630_v15, %v640_v24  ;;  %v433_v34 = vrot.slane %v432_v18, 4  ;;  %v442_v35 = vor.u32 %v441_v19, %v437_v7  ;;  %4170 = vmatpush3.bf16.xpose.msra.mxu1 %v931_v25  ;;  %v596_v36 = vrot.slane %v594_v23, 4  ;;  %v259_v25 = vld [vmem:[%s4666_s11 + $0x24] sm:$0xf] }
  0x37   : > { %v599_v37 = vrot.slane %v597_v26, 5  ;;  %v605_v38 = vrot.slane %v603_v27, 5  ;;  %v607_v39 = vshrl.u32 %v4767_v10, 16  ;;  %v613_v40 = vshll.u32 %v4774_v21, 16 }
  0x38   : > { %4311 = vmatprep.subr.msk.bf16.mxu0 %vm739_vm0, %v3752_v31  ;;  %v438_v42 = vsel %vm4694_vm3, %v433_v34, %v437_v7  ;;  %v443_v43 = vrot.slane %v442_v35, 4  ;;  %v3768_v46 = vcombine.low %v277_v5, %v4767_v10  ;;  %v402_v47 = vshrl.u32 %v261_v29, 16  ;;  %v4800_v5 = vld [vmem:[%s4666_s11 + $0x88] sm:$0xf] }
  0x39   : > { %v600_v48 = vor.u32 %v599_v37, %v596_v36  ;;  %v609_v49 = vrot.slane %v607_v39, 4  ;;  %v615_v50 = vrot.slane %v613_v40, 5  ;;  %v405_v52 = vshll.u32 %v261_v29, 16  ;;  %v4816_v34 = vld [vmem:[%s4666_s11 + $0x28] sm:$0xf] }
  0x3a   : > { %v448_v54 = vsel %vm4694_vm3, %v443_v43, %v447_v20  ;;  %4320 = vmatprep.subr.msk.bf16.mxu1 %vm739_vm0, %v3768_v46  ;;  %v404_v55 = vrot.slane %v402_v47, 4  ;;  %v411_v57 = vshll.u32 %v4784_v41, 16  ;;  %v415_v58 = vshrl.u32 %v4784_v41, 16  ;;  %v4820_v39 = vld [vmem:[%s4666_s11 + $0x2c] sm:$0x1] }
  0x3b   : > { %v3744_v60 = vcombine.low %v438_v42, %v448_v54  ;;  %v601_v61 = vrot.slane %v600_v48, 4  ;;  %v610_v62 = vor.u32 %v609_v49, %v605_v38  ;;  %v407_v63 = vrot.slane %v405_v52, 5 }
  0x3c   : > { %v413_v6 = vrot.slane %v411_v57, 5  ;;  %v417_v7 = vrot.slane %v415_v58, 4  ;;  %v421_v8 = vshll.u32 %v4791_v51, 16  ;;  %v3760_v9 = vcombine.low %v261_v29, %v4784_v41  ;;  %v273_v58 = vld [vmem:[%s4666_s11 + $0x78] sm:$0xf] }
  0x3d   : > { %v759_v15 = vsel %vm739_vm0, %v3744_v60, 0  ;;  %v606_v16 = vsel %vm4694_vm3, %v601_v61, %v605_v38  ;;  %v611_v17 = vrot.slane %v610_v62, 4  ;;  %v408_v18 = vor.u32 %v407_v63, %v404_v55 }
  0x3e   : > { %4152 = vmatpush3.bf16.xpose.msra.mxu0 %v759_v15  ;;  %v418_v19 = vor.u32 %v417_v7, %v413_v6  ;;  %v423_v20 = vrot.slane %v421_v8, 5  ;;  %v928_v23 = vsel %vm739_vm0, %v3760_v9, 0  ;;  %v570_v24 = vshrl.u32 %v275_v59, 16  ;;  %v4839_v15 = vld [vmem:[%s4666_s11 + $0x80] sm:$0x1] }
  0x3f   : > { %v616_v26 = vsel %vm4694_vm3, %v611_v17, %v615_v50  ;;  %v409_v27 = vrot.slane %v408_v18, 4  ;;  %4172 = vmatpush3.bf16.xpose.msra.mxu1 %v928_v23  ;;  %v573_v29 = vshll.u32 %v275_v59, 16  ;;  %v579_v31 = vshll.u32 %v4800_v5, 16 }
  0x40   : > { %v3751_v35 = vcombine.low %v606_v16, %v616_v26  ;;  %v419_v36 = vrot.slane %v418_v19, 4  ;;  %v572_v37 = vrot.slane %v570_v24, 4  ;;  %v583_v38 = vshrl.u32 %v4800_v5, 16 }
  0x41   : > { %v414_v40 = vsel %vm4694_vm3, %v409_v27, %v413_v6  ;;  %v575_v42 = vrot.slane %v573_v29, 5  ;;  %v581_v43 = vrot.slane %v579_v31, 5  ;;  %v589_v46 = vshll.u32 %v4805_v12, 16  ;;  %v4834_v6 = vld [vmem:[%s4666_s11 + $0x7c] sm:$0xf] }
  0x42   : > { %4312 = vmatprep.subr.msk.bf16.mxu0 %vm739_vm0, %v3751_v35  ;;  %v424_v47 = vsel %vm4694_vm3, %v419_v36, %v423_v20  ;;  %v585_v48 = vrot.slane %v583_v38, 4  ;;  %v3767_v49 = vcombine.low %v275_v59, %v4800_v5  ;;  %v378_v50 = vshrl.u32 %v259_v25, 16  ;;  %v257_v27 = vld [vmem:[%s4666_s11 + $0x18] sm:$0xf] }
  0x43   : > { %v3743_v52 = vcombine.low %v414_v40, %v424_v47  ;;  %v576_v54 = vor.u32 %v575_v42, %v572_v37  ;;  %v591_v55 = vrot.slane %v589_v46, 5  ;;  %v381_v57 = vshll.u32 %v259_v25, 16  ;;  %v4849_v37 = vld [vmem:[%s4666_s11 + $0x1c] sm:$0xf] }
  0x44   : > { %v586_v60 = vor.u32 %v585_v48, %v581_v43  ;;  %4321 = vmatprep.subr.msk.bf16.mxu1 %vm739_vm0, %v3767_v49  ;;  %v380_v61 = vrot.slane %v378_v50, 4  ;;  %v387_v62 = vshll.u32 %v4816_v34, 16  ;;  %v391_v63 = vshrl.u32 %v4816_v34, 16 }
  0x45   : > { %v756_v59 = vsel %vm739_vm0, %v3743_v52, 0  ;;  %v577_v7 = vrot.slane %v576_v54, 4  ;;  %v383_v8 = vrot.slane %v381_v57, 5  ;;  %v397_v9 = vshll.u32 %v4820_v39, 16  ;;  %v4859_v54 = vld [vmem:[%s4666_s11 + $0x20] sm:$0x1] }
  0x46   : > { %4154 = vmatpush3.bf16.xpose.msra.mxu0 %v756_v59  ;;  %v587_v16 = vrot.slane %v586_v60, 4  ;;  %v389_v17 = vrot.slane %v387_v62, 5  ;;  %v393_v18 = vrot.slane %v391_v63, 4  ;;  %v3759_v19 = vcombine.low %v259_v25, %v4816_v34  ;;  %v271_v63 = vld [vmem:[%s4666_s11 + $0x6c] sm:$0xf] }
  0x47   : > { %v582_v20 = vsel %vm4694_vm3, %v577_v7, %v581_v43  ;;  %v384_v23 = vor.u32 %v383_v8, %v380_v61  ;;  %v399_v24 = vrot.slane %v397_v9, 5  ;;  %v546_v26 = vshrl.u32 %v273_v58, 16 }
  0x48   : > { %v592_v29 = vsel %vm4694_vm3, %v587_v16, %v591_v55  ;;  %v394_v31 = vor.u32 %v393_v18, %v389_v17  ;;  %v925_v35 = vsel %vm739_vm0, %v3759_v19, 0  ;;  %v549_v36 = vshll.u32 %v273_v58, 16  ;;  %v4867_v16 = vld [vmem:[%s4666_s11 + $0x70] sm:$0xf] }
  0x49   : > { %v3750_v38 = vcombine.low %v582_v20, %v592_v29  ;;  %v385_v40 = vrot.slane %v384_v23, 4  ;;  %4174 = vmatpush3.bf16.xpose.msra.mxu1 %v925_v35  ;;  %v548_v25 = vrot.slane %v546_v26, 4  ;;  %v555_v42 = vshll.u32 %v4834_v6, 16 }
  0x4a   : > { %v395_v43 = vrot.slane %v394_v31, 4  ;;  %v551_v46 = vrot.slane %v549_v36, 5  ;;  %v559_v47 = vshrl.u32 %v4834_v6, 16  ;;  %v565_v48 = vshll.u32 %v4839_v15, 16 }
  0x4b   : > { %4313 = vmatprep.subr.msk.bf16.mxu0 %vm739_vm0, %v3750_v38  ;;  %v390_v49 = vsel %vm4694_vm3, %v385_v40, %v389_v17  ;;  %v557_v50 = vrot.slane %v555_v42, 5  ;;  %v3766_v52 = vcombine.low %v273_v58, %v4834_v6  ;;  %v354_v55 = vshrl.u32 %v257_v27, 16  ;;  %v4876_v38 = vld [vmem:[%s4666_s11 + $0x74] sm:$0x1] }
  0x4c   : > { %v400_v57 = vsel %vm4694_vm3, %v395_v43, %v399_v24  ;;  %v552_v60 = vor.u32 %v551_v46, %v548_v25  ;;  %v561_v61 = vrot.slane %v559_v47, 4  ;;  %v567_v62 = vrot.slane %v565_v48, 5  ;;  %v255_v46 = vld [vmem:[%s4666_s11 + $0xc] sm:$0xf] }
  0x4d   : > { %v3742_v59 = vcombine.low %v390_v49, %v400_v57  ;;  %4322 = vmatprep.subr.msk.bf16.mxu1 %vm739_vm0, %v3766_v52  ;;  %v356_v7 = vrot.slane %v354_v55, 4  ;;  %v357_v8 = vshll.u32 %v257_v27, 16  ;;  %v363_v9 = vshll.u32 %v4849_v37, 16 }
  0x4e   : > { %v553_v58 = vrot.slane %v552_v60, 4  ;;  %v562_v17 = vor.u32 %v561_v61, %v557_v50  ;;  %v367_v18 = vshrl.u32 %v4849_v37, 16  ;;  %v373_v19 = vshll.u32 %v4859_v54, 16 }
  0x4f   : > { %v753_v20 = vsel %vm739_vm0, %v3742_v59, 0  ;;  %v359_v23 = vrot.slane %v357_v8, 5  ;;  %v365_v24 = vrot.slane %v363_v9, 5  ;;  %v3758_v26 = vcombine.low %v257_v27, %v4849_v37 }
  0x50   : > { %4156 = vmatpush3.bf16.xpose.msra.mxu0 %v753_v20  ;;  %v558_v29 = vsel %vm4694_vm3, %v553_v58, %v557_v50  ;;  %v563_v31 = vrot.slane %v562_v17, 4  ;;  %v369_v35 = vrot.slane %v367_v18, 4  ;;  %v375_v36 = vrot.slane %v373_v19, 5  ;;  %v4885_v50 = vld [vmem:[%s4666_s11 + $0x10] sm:$0xf] }
  0x51   : > { %v360_v40 = vor.u32 %v359_v23, %v356_v7  ;;  %v922_v25 = vsel %vm739_vm0, %v3758_v26, 0  ;;  %v522_v42 = vshrl.u32 %v271_v63, 16  ;;  %v525_v43 = vshll.u32 %v271_v63, 16  ;;  %v4893_v17 = vld [vmem:[%s4666_s11 + $0x14] sm:$0x1] }
  0x52   : > { %v568_v47 = vsel %vm4694_vm3, %v563_v31, %v567_v62  ;;  %v370_v27 = vor.u32 %v369_v35, %v365_v24  ;;  %4176 = vmatpush3.bf16.xpose.msra.mxu1 %v922_v25  ;;  %v531_v48 = vshll.u32 %v4867_v16, 16  ;;  %v535_v49 = vshrl.u32 %v4867_v16, 16 }
  0x53   : > { %v3749_v52 = vcombine.low %v558_v29, %v568_v47  ;;  %v361_v55 = vrot.slane %v360_v40, 4  ;;  %v524_v57 = vrot.slane %v522_v42, 4  ;;  %v527_v60 = vrot.slane %v525_v43, 5  ;;  %v269_v29 = vld [vmem:[%s4666_s11 + $0x60] sm:$0xf] }
  0x54   : > { %v371_v61 = vrot.slane %v370_v27, 4  ;;  %v533_v59 = vrot.slane %v531_v48, 5  ;;  %v537_v7 = vrot.slane %v535_v49, 4  ;;  %v541_v8 = vshll.u32 %v4876_v38, 16  ;;  %v4907_v49 = vld [vmem:[%s4666_s11 + $0x64] sm:$0xf] }
  0x55   : > { %4314 = vmatprep.subr.msk.bf16.mxu0 %vm739_vm0, %v3749_v52  ;;  %v366_v62 = vsel %vm4694_vm3, %v361_v55, %v365_v24  ;;  %v528_v9 = vor.u32 %v527_v60, %v524_v57  ;;  %v3765_v58 = vcombine.low %v271_v63, %v4867_v16  ;;  %v330_v18 = vshrl.u32 %v255_v46, 16  ;;  %v4910_v52 = vld [vmem:[%s4666_s11 + $0x68] sm:$0x1] }
  0x56   : > { %v376_v19 = vsel %vm4694_vm3, %v371_v61, %v375_v36  ;;  %v538_v20 = vor.u32 %v537_v7, %v533_v59  ;;  %v543_v23 = vrot.slane %v541_v8, 5  ;;  %v333_v26 = vshll.u32 %v255_v46, 16  ;;  %v253_v7 = vld [vmem:[%s4666_s11] sm:$0xf] }
  0x57   : > { %v3741_v31 = vcombine.low %v366_v62, %v376_v19  ;;  %v529_v35 = vrot.slane %v528_v9, 4  ;;  %4323 = vmatprep.subr.msk.bf16.mxu1 %vm739_vm0, %v3765_v58  ;;  %v332_v24 = vrot.slane %v330_v18, 4  ;;  %v339_v40 = vshll.u32 %v4885_v50, 16 }
  0x58   : > { %v539_v63 = vrot.slane %v538_v20, 4  ;;  %v335_v25 = vrot.slane %v333_v26, 5  ;;  %v343_v42 = vshrl.u32 %v4885_v50, 16  ;;  %v349_v36 = vshll.u32 %v4893_v17, 16 }
  0x59   : > { %v750_v43 = vsel %vm739_vm0, %v3741_v31, 0  ;;  %v534_v47 = vsel %vm4694_vm3, %v529_v35, %v533_v59  ;;  %v341_v27 = vrot.slane %v339_v40, 5  ;;  %v3757_v48 = vcombine.low %v255_v46, %v4885_v50  ;;  %v4922_v35 = vld [vmem:[%s4666_s11 + $0x4] sm:$0xf] }
  0x5a   : > { %4158 = vmatpush3.bf16.xpose.msra.mxu0 %v750_v43  ;;  %v544_v55 = vsel %vm4694_vm3, %v539_v63, %v543_v23  ;;  %v336_v57 = vor.u32 %v335_v25, %v332_v24  ;;  %v345_v60 = vrot.slane %v343_v42, 4  ;;  %v351_v61 = vrot.slane %v349_v36, 5  ;;  %v4928_v43 = vld [vmem:[%s4666_s11 + $0x8] sm:$0x1] }
  0x5b   : > { %v3748_v8 = vcombine.low %v534_v47, %v544_v55  ;;  %v919_v59 = vsel %vm739_vm0, %v3757_v48, 0  ;;  %v498_v62 = vshrl.u32 %v269_v29, 16  ;;  %v501_v46 = vshll.u32 %v269_v29, 16 }
  0x5c   : > { %v337_v9 = vrot.slane %v336_v57, 4  ;;  %v346_v58 = vor.u32 %v345_v60, %v341_v27  ;;  %4178 = vmatpush3.bf16.xpose.msra.mxu1 %v919_v59  ;;  %v507_v18 = vshll.u32 %v4907_v49, 16  ;;  %v511_v19 = vshrl.u32 %v4907_v49, 16 }
  0x5d   : > { %4315 = vmatprep.subr.msk.bf16.mxu0 %vm739_vm0, %v3748_v8  ;;  %v500_v20 = vrot.slane %v498_v62, 4  ;;  %v503_v23 = vrot.slane %v501_v46, 5  ;;  %v517_v26 = vshll.u32 %v4910_v52, 16  ;;  %v3764_v31 = vcombine.low %v269_v29, %v4907_v49  ;;  %v1019_v46 = vld [vmem:[%s4666_s11 + $0xb4] sm:$0xe] }
  0x5e   : > { %v342_v24 = vsel %vm4694_vm3, %v337_v9, %v341_v27  ;;  %v347_v40 = vrot.slane %v346_v58, 4  ;;  %v509_v63 = vrot.slane %v507_v18, 5  ;;  %v513_v25 = vrot.slane %v511_v19, 4 }
  0x5f   : > { %v504_v42 = vor.u32 %v503_v23, %v500_v20  ;;  %v519_v36 = vrot.slane %v517_v26, 5  ;;  %4324 = vmatprep.subr.msk.bf16.mxu1 %vm739_vm0, %v3764_v31  ;;  %v306_v47 = vshrl.u32 %v253_v7, 16  ;;  %v309_v48 = vshll.u32 %v253_v7, 16  ;;  %v4454_v20 = vld [vmem:[%s4666_s11 + $0x60] sm:$0xff]  }
  0x60   : > { %v352_v29 = vsel %vm4694_vm3, %v347_v40, %v351_v61  ;;  %v514_v55 = vor.u32 %v513_v25, %v509_v63  ;;  %v315_v57 = vshll.u32 %v4922_v35, 16  ;;  %v319_v27 = vshrl.u32 %v4922_v35, 16  ;;  %v4453_v40 = vld [vmem:[%s4666_s11 + $0xc0] sm:$0xff]  }
  0x61   : > { %v3740_v60 = vcombine.low %v342_v24, %v352_v29  ;;  %v505_v8 = vrot.slane %v504_v42, 4  ;;  %v308_v59 = vrot.slane %v306_v47, 4  ;;  %v311_v62 = vrot.slane %v309_v48, 5  ;;  %v1011_v24 = vld [vmem:[%s4666_s11 + $0x54] sm:$0xe] }
  0x62   : > { %v515_v9 = vrot.slane %v514_v55, 4  ;;  %v317_v58 = vrot.slane %v315_v57, 5  ;;  %v321_v18 = vrot.slane %v319_v27, 4  ;;  %v325_v19 = vshll.u32 %v4928_v43, 16 }
  0x63   : > { %v747_v61 = vsel %vm739_vm0, %v3740_v60, 0  ;;  %v510_v23 = vsel %vm4694_vm3, %v505_v8, %v509_v63  ;;  %v312_v26 = vor.u32 %v311_v62, %v308_v59  ;;  %v3756_v31 = vcombine.low %v253_v7, %v4922_v35  ;;  %v1018_v63 = vld [vmem:[%s4666_s11 + $0xa8] sm:$0xe] }
  0x64   : > { %4160 = vmatpush3.bf16.xpose.msra.mxu0 %v747_v61  ;;  %v520_v25 = vsel %vm4694_vm3, %v515_v9, %v519_v36  ;;  %v322_v42 = vor.u32 %v321_v18, %v317_v58  ;;  %v327_v47 = vrot.slane %v325_v19, 5  ;;  %v3788_v29 = vrot.slane %v1019_v46, 9  ;;  %v1010_v62 = vld [vmem:[%s4666_s11 + $0x48] sm:$0xe] }
  0x65   : > { %v3747_v55 = vcombine.low %v510_v23, %v520_v25  ;;  %v313_v57 = vrot.slane %v312_v26, 4  ;;  %v916_v7 = vsel %vm739_vm0, %v3756_v31, 0  ;;  %v1162_v27 = vrot.slane %v4670_v3, 5  ;;  %v4456_v23 = vld [vmem:[%s4666_s11 + $0x54] sm:$0xff]  }
  0x66   : > { %v323_v60 = vrot.slane %v322_v42, 4  ;;  %4180 = vmatpush3.bf16.xpose.msra.mxu1 %v916_v7  ;;  %v3780_v36 = vrot.slane %v1011_v24, 9  ;;  %v1106_v8 = vrot.slane %v4682_v13, 5  ;;  %v1454_v59 = vsel %vm739_vm0, %v4454_v20, 0 }
  0x67   : > { %4316 = vmatprep.subr.msk.bf16.mxu0 %vm739_vm0, %v3747_v55  ;;  %v318_v46 = vsel %vm4694_vm3, %v313_v57, %v317_v58  ;;  %v1163_v9 = vsel %vm4947_vm6, %v3788_v29, %v1162_v27  ;;  %v1164_v18 = vrot.slane %v1162_v27, 4  ;;  %4333 = vmatprep.subr.msk.bf16.mxu1 %vm739_vm0, %v4453_v40  ;;  %v3787_v3 = vrot.slane %v1018_v63, 9  ;;  %v1017_v40 = vld [vmem:[%s4666_s11 + $0x9c] sm:$0xe]  ;;  %v4455_v29 = vld [vmem:[%s4666_s11 + $0xb4] sm:$0xff]   ;;  %v4458_v57 = vld [vmem:[%s4666_s11 + $0x48] sm:$0xff]  }
  0x68   : > { %v328_v13 = vsel %vm4694_vm3, %v323_v60, %v327_v47  ;;  %v1107_v19 = vsel %vm4947_vm6, %v3780_v36, %v1106_v8  ;;  %v1108_v20 = vrot.slane %v1106_v8, 4  ;;  %v1155_v61 = vrot.slane %v4700_v33, 5 }
  0x69   : > { %v3739_v58 = vcombine.low %v318_v46, %v328_v13  ;;  %v1166_v26 = vsel %vm4947_vm6, %v1164_v18, %v1165_v11  ;;  %v1158_v31 = vrot.slane %v4708_v45, 5  ;;  %v3779_v24 = vrot.slane %v1010_v62, 9  ;;  %v1016_v62 = vld [vmem:[%s4666_s11 + $0x90] sm:$0xe] }
  0x6a   : > { %v3805_v25 = vcombine.low %v1163_v9, %v1166_v26  ;;  %v1110_v42 = vsel %vm4947_vm6, %v1108_v20, %v1109_v32  ;;  %v4981_v33 = vsel %vm4947_vm6, %v3787_v3, %v1155_v61  ;;  %v1157_v47 = vrot.slane %v1155_v61, 4 }
  0x6b   : > { %v744_v63 = vsel %vm739_vm0, %v3739_v58, 0  ;;  %v3797_v11 = vcombine.low %v1107_v19, %v1110_v42  ;;  %v1099_v45 = vrot.slane %v4715_v56, 5  ;;  %v1102_v55 = vrot.slane %v4725_v2, 5  ;;  %v1008_v19 = vld [vmem:[%s4666_s11 + $0x30] sm:$0xe] }
  0x6c   : > { %4162 = vmatpush3.bf16.xpose.msra.mxu0 %v744_v63  ;;  %v1159_v32 = vsel %vm4947_vm6, %v1157_v47, %v1158_v31  ;;  %v1451_v7 = vsel %vm739_vm0, %v4456_v23, 0  ;;  %v3786_v27 = vrot.slane %v1017_v40, 9  ;;  %v1148_v60 = vrot.slane %v4735_v22, 5  ;;  %v5037_v40 = vld [vmem:[%s6108_s1 + $0x8] sm:$0xf] }
  0x6d   : > { %4182 = vmatmul.mubr.msk.bf16.vlgmr.msra.gmra.mxu1 %vm739_vm0, %v4653_v1  ;;  %4325 = vmatprep.subr.msk.bf16.mxu0 %vm739_vm0, %v3805_v25  ;;  %v1242_v56 = vsel %vm739_vm0, %v3797_v11, 0  ;;  %v3804_v2 = vcombine.low %v4981_v33, %v1159_v32  ;;  %v1100_v36 = vsel %vm4947_vm6, %v3779_v24, %v1099_v45  ;;  %v1101_v8 = vrot.slane %v1099_v45, 4  ;;  %v1015_v24 = vld [vmem:[%s4666_s11 + $0x84] sm:$0xe]  ;;  %v4462_v45 = vld [vmem:[%s4666_s11 + $0x30] sm:$0xff]  }
  0x6e   : > { %4202 = vmatpush3.bf16.xpose.msra.mxu1 %v1454_v59  ;;  %v5008_v22 = vsel %vm4947_vm6, %v3786_v27, %v1148_v60  ;;  %v1150_v46 = vrot.slane %v1148_v60, 4  ;;  %v1151_v1 = vrot.slane %v4741_v30, 5  ;;  %v3778_v9 = vrot.slane %v1009_v4, 9  ;;  %4217 = vmatprep.mubr.msk.bf16.mxu1 %vm739_vm0, %v4992_v14  ;;  %v4460_v30 = vld [vmem:[%s4666_s11 + $0x3c] sm:$0xff]   ;;  %v1007_v11 = vld [vmem:[%s4666_s11 + $0x24] sm:$0xe] }
  0x6f   : > { %v1103_v18 = vsel %vm4947_vm6, %v1101_v8, %v1102_v55  ;;  %4334 = vmatprep.subr.msk.bf16.mxu1 %vm739_vm0, %v4455_v29  ;;  %v1092_v3 = vrot.slane %v4749_v44, 5  ;;  %v1095_v59 = vrot.slane %v4757_v53, 5  ;;  %v5019_v13 = vsel %vm739_vm0, %v4458_v57, 0 }
  0x70   : > { %v3796_v20 = vcombine.low %v1100_v36, %v1103_v18  ;;  %v5025_v61 = vsel %vm4947_vm6, %v1150_v46, %v1151_v1  ;;  %v3785_v23 = vrot.slane %v1016_v62, 9  ;;  %v1141_v58 = vrot.slane %v4767_v10, 5  ;;  %v4457_v10 = vld [vmem:[%s4666_s11 + $0xa8] sm:$0xff]   ;;  %v1006_v1 = vld [vmem:[%s4666_s11 + $0x18] sm:$0xe] }
  0x71   : > { %v3803_v26 = vcombine.low %v5008_v22, %v5025_v61  ;;  %v1093_v44 = vsel %vm4947_vm6, %v3778_v9, %v1092_v3  ;;  %v1094_v53 = vrot.slane %v1092_v3, 4  ;;  %v1144_v31 = vrot.slane %v4774_v21, 5  ;;  %v4464_v9 = vld [vmem:[%s4666_s11 + $0x24] sm:$0xff]  }
  0x72   : > { %v1239_v25 = vsel %vm739_vm0, %v3796_v20, 0  ;;  %v5043_v42 = vsel %vm4947_vm6, %v3785_v23, %v1141_v58  ;;  %v1143_v33 = vrot.slane %v1141_v58, 4  ;;  %v3777_v47 = vrot.slane %v1008_v19, 9  ;;  %v1013_v23 = vld [vmem:[%s4666_s11 + $0x6c] sm:$0xe] }
  0x73   : > { %4164 = vmatmul.mubr.msk.bf16.vlgmr.msra.gmra.mxu0 %vm739_vm0, %v4648_v0  ;;  %v1096_v21 = vsel %vm4947_vm6, %v1094_v53, %v1095_v59  ;;  %v1085_v29 = vrot.slane %v4784_v41, 5  ;;  %v1088_v4 = vrot.slane %v4791_v51, 5  ;;  %v5052_v63 = vsel %vm739_vm0, %v4460_v30, 0 }
  0x74   : > { %4184 = vmatpush3.bf16.xpose.msra.mxu0 %v1242_v56  ;;  %v3795_v55 = vcombine.low %v1093_v44, %v1096_v21  ;;  %v5058_v57 = vsel %vm4947_vm6, %v1143_v33, %v1144_v31  ;;  %v3784_v0 = vrot.slane %v1015_v24, 9  ;;  %v1134_v32 = vrot.slane %v4800_v5, 5  ;;  %4199 = vmatprep.mubr.msk.bf16.mxu0 %vm739_vm0, %v5037_v40  ;;  %v1014_v56 = vld [vmem:[%s4666_s11 + $0x78] sm:$0xe]  ;;  %v4459_v44 = vld [vmem:[%s4666_s11 + $0x9c] sm:$0xff]  }
  0x75   : > { %4326 = vmatprep.subr.msk.bf16.mxu0 %vm739_vm0, %v3804_v2  ;;  %v3802_v41 = vcombine.low %v5043_v42, %v5058_v57  ;;  %v1086_v51 = vsel %vm4947_vm6, %v3777_v47, %v1085_v29  ;;  %v1087_v27 = vrot.slane %v1085_v29, 4  ;;  %v1137_v60 = vrot.slane %v4805_v12, 5  ;;  %v1005_v47 = vld [vmem:[%s4666_s11 + $0xc] sm:$0xe]  ;;  %v4466_v21 = vld [vmem:[%s4666_s11 + $0x18] sm:$0xff]  }
  0x76   : > { %4204 = vmatpush3.bf16.xpose.msra.mxu1 %v1451_v7  ;;  %v5071_v5 = vsel %vm739_vm0, %v3795_v55, 0  ;;  %v5075_v36 = vsel %vm4947_vm6, %v3784_v0, %v1134_v32  ;;  %v1136_v2 = vrot.slane %v1134_v32, 4  ;;  %v3776_v8 = vrot.slane %v1007_v11, 9  ;;  %v1012_v0 = vld [vmem:[%s4666_s11 + $0x60] sm:$0xe] }
  0x77   : > { %4335 = vmatprep.subr.msk.bf16.mxu1 %vm739_vm0, %v4457_v10  ;;  %v1089_v62 = vsel %vm4947_vm6, %v1087_v27, %v1088_v4  ;;  %v1078_v12 = vrot.slane %v4816_v34, 5  ;;  %v1081_v7 = vrot.slane %v4820_v39, 5  ;;  %v5083_v46 = vsel %vm739_vm0, %v4462_v45, 0  ;;  %v1004_v27 = vld [vmem:[%s4666_s11] sm:$0xe] }
  0x78   : > { %v3794_v18 = vcombine.low %v1086_v51, %v1089_v62  ;;  %v5089_v3 = vsel %vm4947_vm6, %v1136_v2, %v1137_v60  ;;  %v3783_v59 = vrot.slane %v1014_v56, 9  ;;  %v1127_v19 = vrot.slane %v4834_v6, 5  ;;  %v4468_v60 = vld [vmem:[%s4666_s11 + $0xc] sm:$0xff]  }
  0x79   : > { %v3801_v34 = vcombine.low %v5075_v36, %v5089_v3  ;;  %v1079_v39 = vsel %vm4947_vm6, %v3776_v8, %v1078_v12  ;;  %v1080_v30 = vrot.slane %v1078_v12, 4  ;;  %v1130_v20 = vrot.slane %v4839_v15, 5 }
  0x7a   : > { %v5099_v58 = vsel %vm739_vm0, %v3794_v18, 0  ;;  %v5104_v53 = vsel %vm4947_vm6, %v3783_v59, %v1127_v19  ;;  %v1129_v6 = vrot.slane %v1127_v19, 4  ;;  %v3775_v31 = vrot.slane %v1006_v1, 9  ;;  %v3902_v1 = vld [vmem:[%s4666_s11 + $0xc0] sm:$0xf] }
  0x7b   : > { %v1082_v24 = vsel %vm4947_vm6, %v1080_v30, %v1081_v7  ;;  %v1071_v10 = vrot.slane %v4849_v37, 5  ;;  %v1074_v33 = vrot.slane %v4859_v54, 5  ;;  %v5111_v15 = vsel %vm739_vm0, %v4464_v9, 0  ;;  %v5167_v19 = vld [vmem:[%s4666_s11 + $0xc4] sm:$0xf] }
  0x7c   : > { %4186 = vmatpush3.bf16.xpose.msra.mxu0 %v1239_v25  ;;  %v3793_v29 = vcombine.low %v1079_v39, %v1082_v24  ;;  %v5117_v4 = vsel %vm4947_vm6, %v1129_v6, %v1130_v20  ;;  %v3782_v11 = vrot.slane %v1013_v23, 9  ;;  %v1120_v45 = vrot.slane %v4867_v16, 5  ;;  %v4461_v39 = vld [vmem:[%s4666_s11 + $0x90] sm:$0xff]  }
  0x7d   : > { %4327 = vmatprep.subr.msk.bf16.mxu0 %vm739_vm0, %v3803_v26  ;;  %v3800_v37 = vcombine.low %v5104_v53, %v5117_v4  ;;  %v1072_v54 = vsel %vm4947_vm6, %v3775_v31, %v1071_v10  ;;  %v1073_v25 = vrot.slane %v1071_v10, 4  ;;  %v1123_v55 = vrot.slane %v4876_v38, 5  ;;  %v5183_v31 = vld [vmem:[%s4666_s11 + $0xc8] sm:$0x1] }
  0x7e   : > { %4206 = vmatpush3.bf16.xpose.msra.mxu1 %v5019_v13  ;;  %v5132_v16 = vsel %vm739_vm0, %v3793_v29, 0  ;;  %v5136_v22 = vsel %vm4947_vm6, %v3782_v11, %v1120_v45  ;;  %v1122_v61 = vrot.slane %v1120_v45, 4  ;;  %v3774_v26 = vrot.slane %v1005_v47, 9 }
  0x7f   : > { %4336 = vmatprep.subr.msk.bf16.mxu1 %vm739_vm0, %v4459_v44  ;;  %v1075_v32 = vsel %vm4947_vm6, %v1073_v25, %v1074_v33  ;;  %v1064_v38 = vrot.slane %v4885_v50, 5  ;;  %v1067_v51 = vrot.slane %v4893_v17, 5  ;;  %v5144_v13 = vsel %vm739_vm0, %v4466_v21, 0  ;;  %v3878_v33 = vld [vmem:[%s4666_s11 + $0x60] sm:$0xf] }
  0x80   : > { %v3792_v56 = vcombine.low %v1072_v54, %v1075_v32  ;;  %v5150_v2 = vsel %vm4947_vm6, %v1122_v61, %v1123_v55  ;;  %v3781_v8 = vrot.slane %v1012_v0, 9  ;;  %v1113_v62 = vrot.slane %v4907_v49, 5  ;;  %v3880_v61 = vld [vmem:[%s4666_s11 + $0x68] sm:$0x1]  ;;  %v3938_v32 = vld [vmem:[%s4666_s11 + $0xc0] sm:$0xe] }
  0x81   : > { %v3799_v50 = vcombine.low %v5136_v22, %v5150_v2  ;;  %v1065_v17 = vsel %vm4947_vm6, %v3774_v26, %v1064_v38  ;;  %v1066_v12 = vrot.slane %v1064_v38, 4  ;;  %v1116_v7 = vrot.slane %v4910_v52, 5 }
  0x82   : > { %v5160_v9 = vsel %vm739_vm0, %v3792_v56, 0  ;;  %v5164_v18 = vsel %vm4947_vm6, %v3781_v8, %v1113_v62  ;;  %v1115_v49 = vrot.slane %v1113_v62, 4  ;;  %v3773_v59 = vrot.slane %v1004_v27, 9  ;;  %v4463_v56 = vld [vmem:[%s4666_s11 + $0x84] sm:$0xff]  }
  0x83   : > { %v1068_v30 = vsel %vm4947_vm6, %v1066_v12, %v1067_v51  ;;  %v1057_v20 = vrot.slane %v4922_v35, 5  ;;  %v1060_v52 = vrot.slane %v4928_v43, 5  ;;  %v5175_v23 = vsel %vm739_vm0, %v4468_v60, 0 }
  0x84   : > { %4188 = vmatpush3.bf16.xpose.msra.mxu0 %v5071_v5  ;;  %v3791_v44 = vcombine.low %v1065_v17, %v1068_v30  ;;  %v5180_v6 = vsel %vm4947_vm6, %v1115_v49, %v1116_v7  ;;  %v1932_v24 = vshrl.u32 %v3902_v1, 16  ;;  %v1935_v10 = vshll.u32 %v3902_v1, 16  ;;  %v3930_v7 = vld [vmem:[%s4666_s11 + $0x60] sm:$0xe] }
  0x85   : > { %4328 = vmatprep.subr.msk.bf16.mxu0 %vm739_vm0, %v3802_v41  ;;  %v3798_v35 = vcombine.low %v5164_v18, %v5180_v6  ;;  %v1058_v43 = vsel %vm4947_vm6, %v3773_v59, %v1057_v20  ;;  %v1059_v5 = vrot.slane %v1057_v20, 4  ;;  %v1941_v47 = vshll.u32 %v5167_v19, 16  ;;  %v3879_v41 = vld [vmem:[%s4666_s11 + $0x64] sm:$0xf]  ;;  %v3893_v6 = vld [vmem:[%s4666_s11 + $0x9c] sm:$0xf] }
  0x86   : > { %4208 = vmatpush3.bf16.xpose.msra.mxu1 %v5052_v63  ;;  %v5197_v21 = vsel %vm739_vm0, %v3791_v44, 0  ;;  %v1934_v29 = vrot.slane %v1932_v24, 4  ;;  %v1937_v42 = vrot.slane %v1935_v10, 5  ;;  %v1945_v57 = vshrl.u32 %v5167_v19, 16  ;;  %v3899_v24 = vld [vmem:[%s4666_s11 + $0xb4] sm:$0xf] }
  0x87   : > { %4337 = vmatprep.subr.msk.bf16.mxu1 %vm739_vm0, %v4461_v39  ;;  %v1061_v11 = vsel %vm4947_vm6, %v1059_v5, %v1060_v52  ;;  %v1943_v45 = vrot.slane %v1941_v47, 5  ;;  %v1951_v54 = vshll.u32 %v5183_v31, 16  ;;  %v1740_v25 = vshrl.u32 %v3878_v33, 16 }
  0x88   : > { %v3790_v63 = vcombine.low %v1058_v43, %v1061_v11  ;;  %v1938_v55 = vor.u32 %v1937_v42, %v1934_v29  ;;  %v1947_v0 = vrot.slane %v1945_v57, 4  ;;  %v1743_v26 = vshll.u32 %v3878_v33, 16  ;;  %v3900_v42 = vld [vmem:[%s4666_s11 + $0xb8] sm:$0xf]  ;;  %v5240_v11 = vld [vmem:[%s4666_s11 + $0xbc] sm:$0x1] }
  0x89   : > { %v1953_v38 = vrot.slane %v1951_v54, 5  ;;  %v1742_v51 = vrot.slane %v1740_v25, 4  ;;  %v1749_v27 = vshll.u32 %v3879_v41, 16  ;;  %v1753_v60 = vshrl.u32 %v3879_v41, 16  ;;  %v3875_v25 = vld [vmem:[%s4666_s11 + $0x54] sm:$0xf] }
  0x8a   : > { %v5209_v8 = vsel %vm739_vm0, %v3790_v63, 0  ;;  %v1939_v62 = vrot.slane %v1938_v55, 4  ;;  %v1948_v17 = vor.u32 %v1947_v0, %v1943_v45  ;;  %v1745_v12 = vrot.slane %v1743_v26, 5 }
  0x8b   : > { %v1751_v1 = vrot.slane %v1749_v27, 5  ;;  %v1755_v49 = vrot.slane %v1753_v60, 4  ;;  %v1759_v59 = vshll.u32 %v3880_v61, 16  ;;  %v3954_v39 = vrot.slane %v3938_v32, 9  ;;  %v5253_v27 = vld [vmem:[%s4666_s11 + $0x5c] sm:$0x1] }
  0x8c   : > { %4190 = vmatpush3.bf16.xpose.msra.mxu0 %v5099_v58  ;;  %v1944_v30 = vsel %vm4694_vm3, %v1939_v62, %v1943_v45  ;;  %v1949_v20 = vrot.slane %v1948_v17, 4  ;;  %v1746_v52 = vor.u32 %v1745_v12, %v1742_v51  ;;  %v2270_v44 = vrot.slane %v5167_v19, 5  ;;  %v3937_v60 = vld [vmem:[%s4666_s11 + $0xb4] sm:$0xe] }
  0x8d   : > { %4329 = vmatprep.subr.msk.bf16.mxu0 %vm739_vm0, %v3801_v34  ;;  %v1756_v10 = vor.u32 %v1755_v49, %v1751_v1  ;;  %v1761_v33 = vrot.slane %v1759_v59, 5  ;;  %v2273_v43 = vrot.slane %v5183_v31, 5  ;;  %v3946_v58 = vrot.slane %v3930_v7, 9 }
  0x8e   : > { %4210 = vmatpush3.bf16.xpose.msra.mxu1 %v5083_v46  ;;  %v1954_v5 = vsel %vm4694_vm3, %v1949_v20, %v1953_v38  ;;  %v1747_v19 = vrot.slane %v1746_v52, 4  ;;  %v5227_v47 = vsel %vm4947_vm6, %v3954_v39, %v2270_v44  ;;  %v2272_v36 = vrot.slane %v2270_v44, 4 }
  0x8f   : > { %4338 = vmatprep.subr.msk.bf16.mxu1 %vm739_vm0, %v4463_v56  ;;  %v5230_v3 = vcombine.low %v1944_v30, %v1954_v5  ;;  %v1757_v34 = vrot.slane %v1756_v10, 4  ;;  %v2214_v31 = vrot.slane %v3879_v41, 5  ;;  %v2217_v29 = vrot.slane %v3880_v61, 5  ;;  %v5250_v61 = vld [vmem:[%s4666_s11 + $0x58] sm:$0xf] }
  0x90   : > { %v1752_v46 = vsel %vm4694_vm3, %v1747_v19, %v1751_v1  ;;  %v5237_v57 = vsel %vm4947_vm6, %v2272_v36, %v2273_v43  ;;  %v1908_v45 = vshrl.u32 %v3899_v24, 16  ;;  %v1911_v54 = vshll.u32 %v3899_v24, 16  ;;  %v4465_v56 = vld [vmem:[%s4666_s11 + $0x78] sm:$0xff]  }
  0x91   : > { %v1762_v41 = vsel %vm4694_vm3, %v1757_v34, %v1761_v33  ;;  %v3971_v63 = vcombine.low %v5227_v47, %v5237_v57  ;;  %v2215_v55 = vsel %vm4947_vm6, %v3946_v58, %v2214_v31  ;;  %v2216_v0 = vrot.slane %v2214_v31, 4  ;;  %v3929_v58 = vld [vmem:[%s4666_s11 + $0x54] sm:$0xe]  ;;  %v3896_v34 = vld [vmem:[%s4666_s11 + $0xa8] sm:$0xf] }
  0x92   : > { %v3913_v26 = vcombine.low %v1752_v46, %v1762_v41  ;;  %v1910_v32 = vrot.slane %v1908_v45, 4  ;;  %v1913_v38 = vrot.slane %v1911_v54, 5  ;;  %v1917_v51 = vshll.u32 %v3900_v42, 16  ;;  %v5282_v54 = vld [vmem:[%s4666_s11 + $0xac] sm:$0xf] }
  0x93   : > { %v2218_v62 = vsel %vm4947_vm6, %v2216_v0, %v2217_v29  ;;  %v1921_v17 = vshrl.u32 %v3900_v42, 16  ;;  %v1927_v12 = vshll.u32 %v5240_v11, 16  ;;  %v1716_v7 = vshrl.u32 %v3875_v25, 16 }
  0x94   : > { %4192 = vmatpush3.bf16.xpose.msra.mxu0 %v5132_v16  ;;  %v5262_v1 = vsel %vm739_vm0, %v3913_v26, 0  ;;  %v3963_v49 = vcombine.low %v2215_v55, %v2218_v62  ;;  %v1914_v59 = vor.u32 %v1913_v38, %v1910_v32  ;;  %v1919_v39 = vrot.slane %v1917_v51, 5  ;;  %v5289_v26 = vld [vmem:[%s4666_s11 + $0xb0] sm:$0x1] }
  0x95   : > { %4330 = vmatprep.subr.msk.bf16.mxu0 %vm739_vm0, %v3800_v37  ;;  %v1923_v30 = vrot.slane %v1921_v17, 4  ;;  %v1929_v20 = vrot.slane %v1927_v12, 5  ;;  %v1718_v52 = vrot.slane %v1716_v7, 4  ;;  %v1719_v44 = vshll.u32 %v3875_v25, 16  ;;  %v4467_v32 = vld [vmem:[%s4666_s11 + $0x6c] sm:$0xff]  }
  0x96   : > { %4212 = vmatpush3.bf16.xpose.msra.mxu1 %v5111_v15  ;;  %v5270_v16 = vsel %vm739_vm0, %v3963_v49, 0  ;;  %v1915_v24 = vrot.slane %v1914_v59, 4  ;;  %v1725_v10 = vshll.u32 %v5250_v61, 16  ;;  %v1729_v33 = vshrl.u32 %v5250_v61, 16  ;;  %v3872_v7 = vld [vmem:[%s4666_s11 + $0x48] sm:$0xf] }
  0x97   : > { %4339 = vmatprep.subr.msk.bf16.mxu1 %vm739_vm0, %v4465_v56  ;;  %v1924_v53 = vor.u32 %v1923_v30, %v1919_v39  ;;  %v1721_v4 = vrot.slane %v1719_v44, 5  ;;  %v1735_v37 = vshll.u32 %v5253_v27, 16  ;;  %v3953_v43 = vrot.slane %v3937_v60, 9 }
  0x98   : > { %v1920_v15 = vsel %vm4694_vm3, %v1915_v24, %v1919_v39  ;;  %v1727_v5 = vrot.slane %v1725_v10, 5  ;;  %v1731_v19 = vrot.slane %v1729_v33, 4  ;;  %v2263_v36 = vrot.slane %v3900_v42, 5 }
  0x99   : > { %v1925_v31 = vrot.slane %v1924_v53, 4  ;;  %v1722_v29 = vor.u32 %v1721_v4, %v1718_v52  ;;  %v1737_v46 = vrot.slane %v1735_v37, 5  ;;  %v2266_v45 = vrot.slane %v5240_v11, 5  ;;  %v5325_v52 = vld [vmem:[%s4666_s11 + $0x50] sm:$0x1] }
  0x9a   : > { %v1732_v25 = vor.u32 %v1731_v19, %v1727_v5  ;;  %v5286_v41 = vsel %vm4947_vm6, %v3953_v43, %v2263_v36  ;;  %v2265_v55 = vrot.slane %v2263_v36, 4  ;;  %v3945_v0 = vrot.slane %v3929_v58, 9  ;;  %v3936_v53 = vld [vmem:[%s4666_s11 + $0xa8] sm:$0xe] }
  0x9b   : > { %v1930_v42 = vsel %vm4694_vm3, %v1925_v31, %v1929_v20  ;;  %v1723_v38 = vrot.slane %v1722_v29, 4  ;;  %v2207_v51 = vrot.slane %v5250_v61, 5  ;;  %v2210_v11 = vrot.slane %v5253_v27, 5 }
  0x9c   : > { %4194 = vmatpush3.bf16.xpose.msra.mxu0 %v5160_v9  ;;  %v5297_v60 = vcombine.low %v1920_v15, %v1930_v42  ;;  %v1733_v56 = vrot.slane %v1732_v25, 4  ;;  %v5301_v62 = vsel %vm4947_vm6, %v2265_v55, %v2266_v45  ;;  %v1884_v17 = vshrl.u32 %v3896_v34, 16 }
  0x9d   : > { %4331 = vmatprep.subr.msk.bf16.mxu0 %vm739_vm0, %v3799_v50  ;;  %v1728_v61 = vsel %vm4694_vm3, %v1723_v38, %v1727_v5  ;;  %v3970_v9 = vcombine.low %v5286_v41, %v5301_v62  ;;  %v2208_v27 = vsel %vm4947_vm6, %v3945_v0, %v2207_v51  ;;  %v2209_v12 = vrot.slane %v2207_v51, 4  ;;  %v3890_v62 = vld [vmem:[%s4666_s11 + $0x90] sm:$0xf] }
  0x9e   : > { %4214 = vmatpush3.bf16.xpose.msra.mxu1 %v5144_v13  ;;  %v1738_v22 = vsel %vm4694_vm3, %v1733_v56, %v1737_v46  ;;  %v1886_v2 = vrot.slane %v1884_v17, 4  ;;  %v1887_v50 = vshll.u32 %v3896_v34, 16  ;;  %v1893_v49 = vshll.u32 %v5282_v54, 16  ;;  %v3873_v13 = vld [vmem:[%s4666_s11 + $0x4c] sm:$0xf] }
  0x9f   : > { %4340 = vmatprep.subr.msk.bf16.mxu1 %vm739_vm0, %v4467_v32  ;;  %v3912_v59 = vcombine.low %v1728_v61, %v1738_v22  ;;  %v2211_v39 = vsel %vm4947_vm6, %v2209_v12, %v2210_v11  ;;  %v1897_v30 = vshrl.u32 %v5282_v54, 16  ;;  %v1903_v20 = vshll.u32 %v5289_v26, 16  ;;  %v3928_v34 = vld [vmem:[%s4666_s11 + $0x48] sm:$0xe]  ;;  %v5361_v12 = vld [vmem:[%s4666_s11 + $0xa4] sm:$0x1] }
  0xa0   : > { %v3962_v44 = vcombine.low %v2208_v27, %v2211_v39  ;;  %v1889_v24 = vrot.slane %v1887_v50, 5  ;;  %v1895_v10 = vrot.slane %v1893_v49, 5  ;;  %v1692_v33 = vshrl.u32 %v3872_v7, 16  ;;  %v5358_v27 = vld [vmem:[%s4666_s11 + $0xa0] sm:$0xf] }
  0xa1   : > { %v5329_v4 = vsel %vm739_vm0, %v3912_v59, 0  ;;  %v1899_v37 = vrot.slane %v1897_v30, 4  ;;  %v1905_v43 = vrot.slane %v1903_v20, 5  ;;  %v1695_v58 = vshll.u32 %v3872_v7, 16  ;;  %v5376_v59 = vld [vmem:[%s4666_s11 + $0x40] sm:$0xf] }
  0xa2   : > { %v5332_v15 = vsel %vm739_vm0, %v3962_v44, 0  ;;  %v1890_v5 = vor.u32 %v1889_v24, %v1886_v2  ;;  %v1694_v19 = vrot.slane %v1692_v33, 4  ;;  %v1701_v36 = vshll.u32 %v3873_v13, 16  ;;  %v5388_v33 = vld [vmem:[%s6108_s1 + $0x14] sm:$0xf] }
  0xa3   : > { %v1900_v31 = vor.u32 %v1899_v37, %v1895_v10  ;;  %v1697_v29 = vrot.slane %v1695_v58, 5  ;;  %v1705_v46 = vshrl.u32 %v3873_v13, 16  ;;  %v1711_v45 = vshll.u32 %v5325_v52, 16 }
  0xa4   : > { %4196 = vmatpush3.bf16.xpose.msra.mxu0 %v5197_v21  ;;  %v1891_v25 = vrot.slane %v1890_v5, 4  ;;  %v1703_v55 = vrot.slane %v1701_v36, 5  ;;  %v3952_v0 = vrot.slane %v3936_v53, 9  ;;  %v2256_v32 = vrot.slane %v5282_v54, 5 }
  0xa5   : > { %4332 = vmatprep.subr.msk.bf16.mxu0 %vm739_vm0, %v3798_v35  ;;  %v1901_v42 = vrot.slane %v1900_v31, 4  ;;  %v1698_v38 = vor.u32 %v1697_v29, %v1694_v19  ;;  %v1707_v51 = vrot.slane %v1705_v46, 4  ;;  %v1713_v11 = vrot.slane %v1711_v45, 5  ;;  %v3935_v45 = vld [vmem:[%s4666_s11 + $0x9c] sm:$0xe] }
  0xa6   : > { %4216 = vmatpush3.bf16.xpose.msra.mxu1 %v5175_v23  ;;  %v1896_v21 = vsel %vm4694_vm3, %v1891_v25, %v1895_v10  ;;  %v5347_v54 = vsel %vm4947_vm6, %v3952_v0, %v2256_v32  ;;  %v2258_v56 = vrot.slane %v2256_v32, 4  ;;  %v2259_v18 = vrot.slane %v5289_v26, 5  ;;  %v3927_v0 = vld [vmem:[%s4666_s11 + $0x3c] sm:$0xe]  ;;  %v5420_v32 = vld [vmem:[%s6108_s1 + $0x10] sm:$0xf] }
  0xa7   : > { %4349 = vmatprep.subr.msk.bf16.mxu1 %vm739_vm0, %v3971_v63  ;;  %v1906_v23 = vsel %vm4694_vm3, %v1901_v42, %v1905_v43  ;;  %v1699_v35 = vrot.slane %v1698_v38, 4  ;;  %v1708_v17 = vor.u32 %v1707_v51, %v1703_v55  ;;  %v3944_v61 = vrot.slane %v3928_v34, 9  ;;  %v3869_v63 = vld [vmem:[%s4666_s11 + $0x3c] sm:$0xf]  ;;  %v5398_v34 = vld [vmem:[%s4666_s11 + $0x44] sm:$0x1] }
  0xa8   : > { %v5363_v7 = vcombine.low %v1896_v21, %v1906_v23  ;;  %v5367_v26 = vsel %vm4947_vm6, %v2258_v56, %v2259_v18  ;;  %v2200_v47 = vrot.slane %v3873_v13, 5  ;;  %v2203_v57 = vrot.slane %v5325_v52, 5 }
  0xa9   : > { %v1704_v22 = vsel %vm4694_vm3, %v1699_v35, %v1703_v55  ;;  %v1709_v2 = vrot.slane %v1708_v17, 4  ;;  %v3969_v50 = vcombine.low %v5347_v54, %v5367_v26  ;;  %v1860_v49 = vshrl.u32 %v3893_v6, 16 }
  0xaa   : > { %v2201_v39 = vsel %vm4947_vm6, %v3944_v61, %v2200_v47  ;;  %v2202_v30 = vrot.slane %v2200_v47, 4  ;;  %v1863_v20 = vshll.u32 %v3893_v6, 16  ;;  %v1869_v13 = vshll.u32 %v5358_v27, 16 }
  0xab   : > { %v1714_v52 = vsel %vm4694_vm3, %v1709_v2, %v1713_v11  ;;  %v1862_v44 = vrot.slane %v1860_v49, 4  ;;  %v1873_v24 = vshrl.u32 %v5358_v27, 16  ;;  %v1879_v10 = vshll.u32 %v5361_v12, 16 }
  0xac   : > { %4198 = vmatpush3.bf16.xpose.msra.mxu0 %v5209_v8  ;;  %v3911_v53 = vcombine.low %v1704_v22, %v1714_v52  ;;  %v2204_v37 = vsel %vm4947_vm6, %v2202_v30, %v2203_v57  ;;  %v1865_v43 = vrot.slane %v1863_v20, 5  ;;  %v1871_v58 = vrot.slane %v1869_v13, 5  ;;  %v3891_v22 = vld [vmem:[%s4666_s11 + $0x94] sm:$0xf]  ;;  %v3866_v52 = vld [vmem:[%s4666_s11 + $0x30] sm:$0xf] }
  0xad   : > { %4341 = vmatprep.subr.msk.bf16.mxu0 %vm739_vm0, %v5230_v3  ;;  %4218 = vmatmul.mubr.msk.bf16.vlgmr.msra.gmra.mxu1 %vm739_vm0, %v4992_v14  ;;  %v3961_v5 = vcombine.low %v2201_v39, %v2204_v37  ;;  %v1875_v19 = vrot.slane %v1873_v24, 4  ;;  %v1881_v36 = vrot.slane %v1879_v10, 5  ;;  %v1668_v8 = vshrl.u32 %v3869_v63, 16  ;;  %v3892_v39 = vld [vmem:[%s4666_s11 + $0x98] sm:$0x1] }
  0xae   : > { %4238 = vmatpush3.bf16.xpose.msra.mxu1 %v5270_v16  ;;  %v5402_v31 = vsel %vm739_vm0, %v3911_v53, 0  ;;  %v1866_v29 = vor.u32 %v1865_v43, %v1862_v44  ;;  %v1671_v46 = vshll.u32 %v3869_v63, 16  ;;  %v1677_v3 = vshll.u32 %v5376_v59, 16  ;;  %4253 = vmatprep.mubr.msk.bf16.mxu1 %vm739_vm0, %v5388_v33  ;;  %v3867_v44 = vld [vmem:[%s4666_s11 + $0x34] sm:$0xf] }
  0xaf   : > { %4350 = vmatprep.subr.msk.bf16.mxu1 %vm739_vm0, %v3970_v9  ;;  %v5413_v14 = vsel %vm739_vm0, %v3961_v5, 0  ;;  %v1876_v16 = vor.u32 %v1875_v19, %v1871_v58  ;;  %v1670_v25 = vrot.slane %v1668_v8, 4  ;;  %v1681_v55 = vshrl.u32 %v5376_v59, 16  ;;  %v5464_v37 = vld [vmem:[%s4666_s11 + $0x38] sm:$0x1] }
  0xb0   : > { %v1867_v42 = vrot.slane %v1866_v29, 4  ;;  %v1673_v38 = vrot.slane %v1671_v46, 5  ;;  %v1679_v51 = vrot.slane %v1677_v3, 5  ;;  %v1687_v41 = vshll.u32 %v5398_v34, 16  ;;  %v3934_v3 = vld [vmem:[%s4666_s11 + $0x90] sm:$0xe] }
  0xb1   : > { %v1877_v9 = vrot.slane %v1876_v16, 4  ;;  %v1683_v11 = vrot.slane %v1681_v55, 4  ;;  %v3951_v21 = vrot.slane %v3935_v45, 9  ;;  %v2249_v56 = vrot.slane %v5358_v27, 5 }
  0xb2   : > { %v1872_v18 = vsel %vm4694_vm3, %v1867_v42, %v1871_v58  ;;  %v1674_v6 = vor.u32 %v1673_v38, %v1670_v25  ;;  %v1689_v23 = vrot.slane %v1687_v41, 5  ;;  %v2252_v35 = vrot.slane %v5361_v12, 5 }
  0xb3   : > { %4200 = vmatmul.mubr.msk.bf16.vlgmr.msra.gmra.mxu0 %vm739_vm0, %v5037_v40  ;;  %v1882_v17 = vsel %vm4694_vm3, %v1877_v9, %v1881_v36  ;;  %v1684_v61 = vor.u32 %v1683_v11, %v1679_v51  ;;  %v5434_v47 = vsel %vm4947_vm6, %v3951_v21, %v2249_v56  ;;  %v2251_v27 = vrot.slane %v2249_v56, 4  ;;  %v3926_v21 = vld [vmem:[%s4666_s11 + $0x30] sm:$0xe] }
  0xb4   : > { %4220 = vmatpush3.bf16.xpose.msra.mxu0 %v5262_v1  ;;  %v5437_v57 = vcombine.low %v1872_v18, %v1882_v17  ;;  %v1675_v63 = vrot.slane %v1674_v6, 4  ;;  %v3943_v12 = vrot.slane %v3927_v0, 9  ;;  %v2193_v40 = vrot.slane %v5376_v59, 5  ;;  %4235 = vmatprep.mubr.msk.bf16.mxu0 %vm739_vm0, %v5420_v32 }
  0xb5   : > { %4342 = vmatprep.subr.msk.bf16.mxu0 %vm739_vm0, %v5297_v60  ;;  %v1685_v2 = vrot.slane %v1684_v61, 4  ;;  %v2253_v49 = vsel %vm4947_vm6, %v2251_v27, %v2252_v35  ;;  %v2196_v1 = vrot.slane %v5398_v34, 5  ;;  %v1836_v30 = vshrl.u32 %v3890_v62, 16 }
  0xb6   : > { %4240 = vmatpush3.bf16.xpose.msra.mxu1 %v5332_v15  ;;  %v1680_v59 = vsel %vm4694_vm3, %v1675_v63, %v1679_v51  ;;  %v3968_v20 = vcombine.low %v5434_v47, %v2253_v49  ;;  %v2194_v13 = vsel %vm4947_vm6, %v3943_v12, %v2193_v40  ;;  %v2195_v60 = vrot.slane %v2193_v40, 4  ;;  %v5486_v47 = vld [vmem:[%s4666_s11 + $0x88] sm:$0xf] }
  0xb7   : > { %4351 = vmatprep.subr.msk.bf16.mxu1 %vm739_vm0, %v3969_v50  ;;  %v1690_v24 = vsel %vm4694_vm3, %v1685_v2, %v1689_v23  ;;  %v1838_v15 = vrot.slane %v1836_v30, 4  ;;  %v1839_v10 = vshll.u32 %v3890_v62, 16  ;;  %v1845_v53 = vshll.u32 %v3891_v22, 16  ;;  %v3887_v23 = vld [vmem:[%s4666_s11 + $0x84] sm:$0xf] }
  0xb8   : > { %v3910_v43 = vcombine.low %v1680_v59, %v1690_v24  ;;  %v2197_v58 = vsel %vm4947_vm6, %v2195_v60, %v2196_v1  ;;  %v1849_v5 = vshrl.u32 %v3891_v22, 16  ;;  %v1855_v19 = vshll.u32 %v3892_v39, 16  ;;  %v5494_v1 = vld [vmem:[%s4666_s11 + $0x8c] sm:$0x1] }
  0xb9   : > { %v3960_v36 = vcombine.low %v2194_v13, %v2197_v58  ;;  %v1841_v34 = vrot.slane %v1839_v10, 5  ;;  %v1847_v54 = vrot.slane %v1845_v53, 5  ;;  %v1644_v26 = vshrl.u32 %v3866_v52, 16 }
  0xba   : > { %v5469_v50 = vsel %vm739_vm0, %v3910_v43, 0  ;;  %v1851_v8 = vrot.slane %v1849_v5, 4  ;;  %v1857_v29 = vrot.slane %v1855_v19, 5  ;;  %v1647_v46 = vshll.u32 %v3866_v52, 16  ;;  %v3864_v43 = vld [vmem:[%s4666_s11 + $0x28] sm:$0xf] }
  0xbb   : > { %v2341_v45 = vsel %vm739_vm0, %v3960_v36, 0  ;;  %v1842_v16 = vor.u32 %v1841_v34, %v1838_v15  ;;  %v1646_v25 = vrot.slane %v1644_v26, 4  ;;  %v1653_v55 = vshll.u32 %v3867_v44, 16  ;;  %v3863_v15 = vld [vmem:[%s4666_s11 + $0x24] sm:$0xf] }
  0xbc   : > { %4222 = vmatpush3.bf16.xpose.msra.mxu0 %v5329_v4  ;;  %v1852_v0 = vor.u32 %v1851_v8, %v1847_v54  ;;  %v1649_v42 = vrot.slane %v1647_v46, 5  ;;  %v1657_v38 = vshrl.u32 %v3867_v44, 16  ;;  %v1663_v51 = vshll.u32 %v5464_v37, 16  ;;  %v3865_v26 = vld [vmem:[%s4666_s11 + $0x2c] sm:$0x1] }
  0xbd   : > { %4343 = vmatprep.subr.msk.bf16.mxu0 %vm739_vm0, %v5363_v7  ;;  %v1843_v41 = vrot.slane %v1842_v16, 4  ;;  %v1655_v62 = vrot.slane %v1653_v55, 5  ;;  %v3950_v9 = vrot.slane %v3934_v3, 9  ;;  %v2242_v11 = vrot.slane %v3891_v22, 5  ;;  %v3933_v16 = vld [vmem:[%s4666_s11 + $0x84] sm:$0xe] }
  0xbe   : > { %4242 = vmatpush3.bf16.xpose.msra.mxu1 %v5413_v14  ;;  %v1853_v56 = vrot.slane %v1852_v0, 4  ;;  %v1650_v18 = vor.u32 %v1649_v42, %v1646_v25  ;;  %v1659_v4 = vrot.slane %v1657_v38, 4  ;;  %v1665_v6 = vrot.slane %v1663_v51, 5 }
  0xbf   : > { %4352 = vmatprep.subr.msk.bf16.mxu1 %vm739_vm0, %v3968_v20  ;;  %v1848_v35 = vsel %vm4694_vm3, %v1843_v41, %v1847_v54  ;;  %v2243_v7 = vsel %vm4947_vm6, %v3950_v9, %v2242_v11  ;;  %v2244_v17 = vrot.slane %v2242_v11, 4  ;;  %v2245_v61 = vrot.slane %v3892_v39, 5 }
  0xc0   : > { %v1858_v14 = vsel %vm4694_vm3, %v1853_v56, %v1857_v29  ;;  %v1651_v27 = vrot.slane %v1650_v18, 4  ;;  %v1660_v63 = vor.u32 %v1659_v4, %v1655_v62  ;;  %v3942_v12 = vrot.slane %v3926_v21, 9  ;;  %v3925_v56 = vld [vmem:[%s4666_s11 + $0x24] sm:$0xe] }
  0xc1   : > { %v3917_v40 = vcombine.low %v1848_v35, %v1858_v14  ;;  %v2246_v22 = vsel %vm4947_vm6, %v2244_v17, %v2245_v61  ;;  %v2186_v2 = vrot.slane %v3867_v44, 5  ;;  %v2189_v49 = vrot.slane %v5464_v37, 5  ;;  %v3884_v35 = vld [vmem:[%s4666_s11 + $0x78] sm:$0xf] }
  0xc2   : > { %v1656_v39 = vsel %vm4694_vm3, %v1651_v27, %v1655_v62  ;;  %v1661_v30 = vrot.slane %v1660_v63, 4  ;;  %v3967_v59 = vcombine.low %v2243_v7, %v2246_v22  ;;  %v1812_v20 = vshrl.u32 %v3887_v23, 16  ;;  %v3885_v22 = vld [vmem:[%s4666_s11 + $0x7c] sm:$0xf] }
  0xc3   : > { %v2187_v13 = vsel %vm4947_vm6, %v3942_v12, %v2186_v2  ;;  %v2188_v60 = vrot.slane %v2186_v2, 4  ;;  %v1815_v52 = vshll.u32 %v3887_v23, 16  ;;  %v1821_v24 = vshll.u32 %v5486_v47, 16 }
  0xc4   : > { %4224 = vmatpush3.bf16.xpose.msra.mxu0 %v5402_v31  ;;  %v1666_v44 = vsel %vm4694_vm3, %v1661_v30, %v1665_v6  ;;  %v1814_v10 = vrot.slane %v1812_v20, 4  ;;  %v1825_v53 = vshrl.u32 %v5486_v47, 16  ;;  %v1831_v37 = vshll.u32 %v5494_v1, 16 }
  0xc5   : > { %4344 = vmatprep.subr.msk.bf16.mxu0 %vm739_vm0, %v5437_v57  ;;  %v3909_v58 = vcombine.low %v1656_v39, %v1666_v44  ;;  %v2190_v5 = vsel %vm4947_vm6, %v2188_v60, %v2189_v49  ;;  %v1817_v19 = vrot.slane %v1815_v52, 5  ;;  %v1823_v36 = vrot.slane %v1821_v24, 5 }
  0xc6   : > { %4244 = vmatpush3.bf16.xpose.msra.mxu1 %v2341_v45  ;;  %v3959_v31 = vcombine.low %v2187_v13, %v2190_v5  ;;  %v1827_v34 = vrot.slane %v1825_v53, 4  ;;  %v1833_v54 = vrot.slane %v1831_v37, 5  ;;  %v1620_v8 = vshrl.u32 %v3863_v15, 16  ;;  %v3860_v13 = vld [vmem:[%s4666_s11 + $0x18] sm:$0xf] }
  0xc7   : > { %v5514_v29 = vsel %vm739_vm0, %v3909_v58, 0  ;;  %4353 = vmatprep.subr.msk.bf16.mxu1 %vm739_vm0, %v3967_v59  ;;  %v1818_v46 = vor.u32 %v1817_v19, %v1814_v10  ;;  %v1623_v57 = vshll.u32 %v3863_v15, 16  ;;  %v1629_v3 = vshll.u32 %v3864_v43, 16 }
  0xc8   : > { %v2338_v25 = vsel %vm739_vm0, %v3959_v31, 0  ;;  %v1828_v55 = vor.u32 %v1827_v34, %v1823_v36  ;;  %v1622_v45 = vrot.slane %v1620_v8, 4  ;;  %v1633_v0 = vshrl.u32 %v3864_v43, 16 }
  0xc9   : > { %v1819_v42 = vrot.slane %v1818_v46, 4  ;;  %v1625_v38 = vrot.slane %v1623_v57, 5  ;;  %v1631_v51 = vrot.slane %v1629_v3, 5  ;;  %v1639_v41 = vshll.u32 %v3865_v26, 16  ;;  %v3932_v46 = vld [vmem:[%s4666_s11 + $0x78] sm:$0xe] }
  0xca   : > { %v1829_v62 = vrot.slane %v1828_v55, 4  ;;  %v1635_v9 = vrot.slane %v1633_v0, 4  ;;  %v3949_v11 = vrot.slane %v3933_v16, 9  ;;  %v2235_v21 = vrot.slane %v5486_v47, 5 }
  0xcb   : > { %v1824_v18 = vsel %vm4694_vm3, %v1819_v42, %v1823_v36  ;;  %v1626_v4 = vor.u32 %v1625_v38, %v1622_v45  ;;  %v1641_v6 = vrot.slane %v1639_v41, 5  ;;  %v2238_v23 = vrot.slane %v5494_v1, 5  ;;  %v3886_v1 = vld [vmem:[%s4666_s11 + $0x80] sm:$0x1] }
  0xcc   : > { %4226 = vmatpush3.bf16.xpose.msra.mxu0 %v5469_v50  ;;  %v1834_v7 = vsel %vm4694_vm3, %v1829_v62, %v1833_v54  ;;  %v1636_v17 = vor.u32 %v1635_v9, %v1631_v51  ;;  %v2236_v61 = vsel %vm4947_vm6, %v3949_v11, %v2235_v21  ;;  %v2237_v47 = vrot.slane %v2235_v21, 4  ;;  %v3862_v36 = vld [vmem:[%s4666_s11 + $0x20] sm:$0x1]  ;;  %v3924_v9 = vld [vmem:[%s4666_s11 + $0x18] sm:$0xe] }
  0xcd   : > { %4345 = vmatprep.subr.msk.bf16.mxu0 %vm739_vm0, %v3917_v40  ;;  %v3916_v14 = vcombine.low %v1824_v18, %v1834_v7  ;;  %v1627_v27 = vrot.slane %v1626_v4, 4  ;;  %v3941_v63 = vrot.slane %v3925_v56, 9  ;;  %v2179_v12 = vrot.slane %v3864_v43, 5  ;;  %v3861_v43 = vld [vmem:[%s4666_s11 + $0x1c] sm:$0xf] }
  0xce   : > { %4246 = vmatpush3.bf16.xpose.msra.mxu1 %v2338_v25  ;;  %v1637_v2 = vrot.slane %v1636_v17, 4  ;;  %v2239_v50 = vsel %vm4947_vm6, %v2237_v47, %v2238_v23  ;;  %v2182_v49 = vrot.slane %v3865_v26, 5  ;;  %v1788_v39 = vshrl.u32 %v3884_v35, 16 }
  0xcf   : > { %v1632_v30 = vsel %vm4694_vm3, %v1627_v27, %v1631_v51  ;;  %v3966_v59 = vcombine.low %v2236_v61, %v2239_v50  ;;  %v2180_v40 = vsel %vm4947_vm6, %v3941_v63, %v2179_v12  ;;  %v2181_v20 = vrot.slane %v2179_v12, 4 }
  0xd0   : > { %v1642_v60 = vsel %vm4694_vm3, %v1637_v2, %v1641_v6  ;;  %v1790_v52 = vrot.slane %v1788_v39, 4  ;;  %v1791_v24 = vshll.u32 %v3884_v35, 16  ;;  %v1797_v15 = vshll.u32 %v3885_v22, 16  ;;  %v3881_v35 = vld [vmem:[%s4666_s11 + $0x6c] sm:$0xf] }
  0xd1   : > { %v3908_v44 = vcombine.low %v1632_v30, %v1642_v60  ;;  %4354 = vmatprep.subr.msk.bf16.mxu1 %vm739_vm0, %v3966_v59  ;;  %v2183_v10 = vsel %vm4947_vm6, %v2181_v20, %v2182_v49  ;;  %v1801_v53 = vshrl.u32 %v3885_v22, 16  ;;  %v1807_v37 = vshll.u32 %v3886_v1, 16  ;;  %v5564_v2 = vld [vmem:[%s4666_s11 + $0x74] sm:$0x1] }
  0xd2   : > { %v3958_v58 = vcombine.low %v2180_v40, %v2183_v10  ;;  %v1793_v5 = vrot.slane %v1791_v24, 5  ;;  %v1799_v19 = vrot.slane %v1797_v15, 5  ;;  %v1596_v31 = vshrl.u32 %v3860_v13, 16 }
  0xd3   : > { %v2015_v34 = vsel %vm739_vm0, %v3908_v44, 0  ;;  %v1803_v54 = vrot.slane %v1801_v53, 4  ;;  %v1809_v26 = vrot.slane %v1807_v37, 5  ;;  %v1599_v8 = vshll.u32 %v3860_v13, 16  ;;  %v3857_v13 = vld [vmem:[%s4666_s11 + $0xc] sm:$0xf] }
  0xd4   : > { %4228 = vmatpush3.bf16.xpose.msra.mxu0 %v5514_v29  ;;  %v2335_v57 = vsel %vm739_vm0, %v3958_v58, 0  ;;  %v1794_v3 = vor.u32 %v1793_v5, %v1790_v52  ;;  %v1598_v16 = vrot.slane %v1596_v31, 4  ;;  %v1605_v25 = vshll.u32 %v3861_v43, 16  ;;  %v3858_v44 = vld [vmem:[%s4666_s11 + $0x10] sm:$0xf] }
  0xd5   : > { %4346 = vmatprep.subr.msk.bf16.mxu0 %vm739_vm0, %v3916_v14  ;;  %v1804_v55 = vor.u32 %v1803_v54, %v1799_v19  ;;  %v1601_v45 = vrot.slane %v1599_v8, 5  ;;  %v1609_v0 = vshrl.u32 %v3861_v43, 16  ;;  %v1615_v42 = vshll.u32 %v3862_v36, 16  ;;  %v3882_v14 = vld [vmem:[%s4666_s11 + $0x70] sm:$0xf] }
  0xd6   : > { %4248 = vmatpush3.bf16.xpose.msra.mxu1 %v2335_v57  ;;  %v1795_v38 = vrot.slane %v1794_v3, 4  ;;  %v1607_v51 = vrot.slane %v1605_v25, 5  ;;  %v3948_v41 = vrot.slane %v3932_v46, 9  ;;  %v2228_v62 = vrot.slane %v3885_v22, 5  ;;  %v3931_v46 = vld [vmem:[%s4666_s11 + $0x6c] sm:$0xe] }
  0xd7   : > { %v1805_v29 = vrot.slane %v1804_v55, 4  ;;  %v1602_v11 = vor.u32 %v1601_v45, %v1598_v16  ;;  %v1611_v21 = vrot.slane %v1609_v0, 4  ;;  %v1617_v56 = vrot.slane %v1615_v42, 5 }
  0xd8   : > { %v1800_v18 = vsel %vm4694_vm3, %v1795_v38, %v1799_v19  ;;  %v2229_v4 = vsel %vm4947_vm6, %v3948_v41, %v2228_v62  ;;  %v2230_v6 = vrot.slane %v2228_v62, 4  ;;  %v2231_v23 = vrot.slane %v3886_v1, 5  ;;  %v4470_v38 = vld [vmem:[%s4666_s11 + $0x6c] sm:$0xff]  }
  0xd9   : > { %v1810_v7 = vsel %vm4694_vm3, %v1805_v29, %v1809_v26  ;;  %v1603_v17 = vrot.slane %v1602_v11, 4  ;;  %v1612_v61 = vor.u32 %v1611_v21, %v1607_v51  ;;  %v3940_v47 = vrot.slane %v3924_v9, 9  ;;  %v3923_v29 = vld [vmem:[%s4666_s11 + $0xc] sm:$0xe] }
  0xda   : > { %v3915_v27 = vcombine.low %v1800_v18, %v1810_v7  ;;  %v2232_v63 = vsel %vm4947_vm6, %v2230_v6, %v2231_v23  ;;  %v2172_v12 = vrot.slane %v3861_v43, 5  ;;  %v2175_v22 = vrot.slane %v3862_v36, 5  ;;  %v3859_v36 = vld [vmem:[%s4666_s11 + $0x14] sm:$0x1]  ;;  %v4068_v7 = vld [vmem:[%s4666_s11 + $0xcc] sm:$0xf] }
  0xdb   : > { %v1608_v50 = vsel %vm4694_vm3, %v1603_v17, %v1607_v51  ;;  %v1613_v49 = vrot.slane %v1612_v61, 4  ;;  %v3965_v1 = vcombine.low %v2229_v4, %v2232_v63  ;;  %v1764_v39 = vshrl.u32 %v3881_v35, 16 }
  0xdc   : > { %4230 = vmatpush3.bf16.xpose.msra.mxu0 %v2015_v34  ;;  %v2173_v30 = vsel %vm4947_vm6, %v3940_v47, %v2172_v12  ;;  %v2174_v59 = vrot.slane %v2172_v12, 4  ;;  %v1767_v40 = vshll.u32 %v3881_v35, 16  ;;  %v1773_v20 = vshll.u32 %v3882_v14, 16 }
  0xdd   : > { %4347 = vmatprep.subr.msk.bf16.mxu0 %vm739_vm0, %v3915_v27  ;;  %v1618_v60 = vsel %vm4694_vm3, %v1613_v49, %v1617_v56  ;;  %4355 = vmatprep.subr.msk.bf16.mxu1 %vm739_vm0, %v3965_v1  ;;  %v1766_v52 = vrot.slane %v1764_v39, 4  ;;  %v1777_v24 = vshrl.u32 %v3882_v14, 16  ;;  %v1783_v15 = vshll.u32 %v5564_v2, 16  ;;  %v5594_v27 = vld [vmem:[%s4666_s11 + $0xd0] sm:$0xf] }
  0xde   : > { %v3907_v10 = vcombine.low %v1608_v50, %v1618_v60  ;;  %v2176_v53 = vsel %vm4947_vm6, %v2174_v59, %v2175_v22  ;;  %v1769_v37 = vrot.slane %v1767_v40, 5  ;;  %v1775_v43 = vrot.slane %v1773_v20, 5  ;;  %v5602_v50 = vld [vmem:[%s4666_s11 + $0xd4] sm:$0x1]  ;;  %v4044_v60 = vld [vmem:[%s4666_s11 + $0x6c] sm:$0xf] }
  0xdf   : > { %v3957_v58 = vcombine.low %v2173_v30, %v2176_v53  ;;  %v1779_v5 = vrot.slane %v1777_v24, 4  ;;  %v1785_v19 = vrot.slane %v1783_v15, 5  ;;  %v1572_v31 = vshrl.u32 %v3857_v13, 16  ;;  %v4469_v15 = vld [vmem:[%s4666_s11 + $0xcc] sm:$0xff]  }
  0xe0   : > { %v2012_v34 = vsel %vm739_vm0, %v3907_v10, 0  ;;  %v1770_v54 = vor.u32 %v1769_v37, %v1766_v52  ;;  %v1575_v26 = vshll.u32 %v3857_v13, 16  ;;  %v1581_v8 = vshll.u32 %v3858_v44, 16  ;;  %v5620_v53 = vld [vmem:[%s4666_s11 + $0x70] sm:$0xf] }
  0xe1   : > { %v2332_v57 = vsel %vm739_vm0, %v3957_v58, 0  ;;  %v1780_v3 = vor.u32 %v1779_v5, %v1775_v43  ;;  %v1574_v16 = vrot.slane %v1572_v31, 4  ;;  %v1585_v25 = vshrl.u32 %v3858_v44, 16 }
  0xe2   : > { %4250 = vmatpush3.bf16.xpose.msra.mxu1 %v2332_v57  ;;  %v1771_v55 = vrot.slane %v1770_v54, 4  ;;  %v1577_v45 = vrot.slane %v1575_v26, 5  ;;  %v1583_v0 = vrot.slane %v1581_v8, 5  ;;  %v1591_v42 = vshll.u32 %v3859_v36, 16 }
  0xe3   : > { %v1781_v51 = vrot.slane %v1780_v3, 4  ;;  %v1587_v41 = vrot.slane %v1585_v25, 4  ;;  %v3947_v62 = vrot.slane %v3931_v46, 9  ;;  %v2221_v9 = vrot.slane %v3882_v14, 5 }
  0xe4   : > { %4232 = vmatpush3.bf16.xpose.msra.mxu0 %v2012_v34  ;;  %v1776_v11 = vsel %vm4694_vm3, %v1771_v55, %v1775_v43  ;;  %v1578_v21 = vor.u32 %v1577_v45, %v1574_v16  ;;  %v1593_v56 = vrot.slane %v1591_v42, 5  ;;  %v2224_v18 = vrot.slane %v5564_v2, 5  ;;  %v4065_v16 = vld [vmem:[%s4666_s11 + $0xc0] sm:$0xf]  ;;  %v5634_v42 = vld [vmem:[%s4666_s11 + $0xc4] sm:$0xf] }
  0xe5   : > { %v1786_v4 = vsel %vm4694_vm3, %v1781_v51, %v1785_v19  ;;  %v1588_v6 = vor.u32 %v1587_v41, %v1583_v0  ;;  %v2222_v23 = vsel %vm4947_vm6, %v3947_v62, %v2221_v9  ;;  %v2223_v35 = vrot.slane %v2221_v9, 4  ;;  %v5623_v19 = vld [vmem:[%s4666_s11 + $0x74] sm:$0x1] }
  0xe6   : > { %v3914_v17 = vcombine.low %v1776_v11, %v1786_v4  ;;  %v1579_v61 = vrot.slane %v1578_v21, 4  ;;  %v3939_v47 = vrot.slane %v3923_v29, 9  ;;  %v2165_v14 = vrot.slane %v3858_v44, 5  ;;  %v5642_v4 = vld [vmem:[%s4666_s11 + $0xc8] sm:$0x1] }
  0xe7   : > { %v1589_v63 = vrot.slane %v1588_v6, 4  ;;  %v2225_v12 = vsel %vm4947_vm6, %v2223_v35, %v2224_v18  ;;  %v2168_v22 = vrot.slane %v3859_v36, 5  ;;  %v5599_v2 = vsel %vm739_vm0, %v4470_v38, 0  ;;  %v4472_v36 = vld [vmem:[%s4666_s11 + $0x60] sm:$0xff]  }
  0xe8   : > { %4348 = vmatprep.subr.msk.bf16.mxu0 %vm739_vm0, %v3914_v17  ;;  %v1584_v49 = vsel %vm4694_vm3, %v1579_v61, %v1583_v0  ;;  %v3964_v1 = vcombine.low %v2222_v23, %v2225_v12  ;;  %v2166_v39 = vsel %vm4947_vm6, %v3939_v47, %v2165_v14  ;;  %v2167_v30 = vrot.slane %v2165_v14, 4  ;;  %v4041_v35 = vld [vmem:[%s4666_s11 + $0x60] sm:$0xf] }
  0xe9   : > { %v1594_v59 = vsel %vm4694_vm3, %v1589_v63, %v1593_v56  ;;  %v3040_v40 = vshrl.u32 %v4068_v7, 16  ;;  %v3043_v20 = vshll.u32 %v4068_v7, 16  ;;  %v3049_v13 = vshll.u32 %v5594_v27, 16  ;;  %v4471_v61 = vld [vmem:[%s4666_s11 + $0xc0] sm:$0xff]  }
  0xea   : > { %v3906_v52 = vcombine.low %v1584_v49, %v1594_v59  ;;  %4356 = vmatprep.subr.msk.bf16.mxu1 %vm739_vm0, %v3964_v1  ;;  %v2169_v24 = vsel %vm4947_vm6, %v2167_v30, %v2168_v22  ;;  %v3053_v44 = vshrl.u32 %v5594_v27, 16  ;;  %v3059_v10 = vshll.u32 %v5602_v50, 16  ;;  %v5651_v63 = vld [vmem:[%s4666_s11 + $0x64] sm:$0xf]  ;;  %v5657_v30 = vld [vmem:[%s6108_s1 + $0x18] sm:$0xf] }
  0xeb   : > { %v3956_v37 = vcombine.low %v2166_v39, %v2169_v24  ;;  %v3042_v43 = vrot.slane %v3040_v40, 4  ;;  %v3045_v58 = vrot.slane %v3043_v20, 5  ;;  %v3051_v5 = vrot.slane %v3049_v13, 5  ;;  %v4474_v39 = vld [vmem:[%s4666_s11 + $0x54] sm:$0xff]   ;;  %v5673_v24 = vld [vmem:[%s4666_s11 + $0x68] sm:$0x1] }
  0xec   : > { %v2009_v31 = vsel %vm739_vm0, %v3906_v52, 0  ;;  %v3055_v34 = vrot.slane %v3053_v44, 4  ;;  %v3061_v54 = vrot.slane %v3059_v10, 5  ;;  %v2848_v26 = vshrl.u32 %v4044_v60, 16 }
  0xed   : > { %4234 = vmatpush3.bf16.xpose.msra.mxu0 %v2009_v31  ;;  %v2329_v8 = vsel %vm739_vm0, %v3956_v37, 0  ;;  %v3046_v46 = vor.u32 %v3045_v58, %v3042_v43  ;;  %v2851_v57 = vshll.u32 %v4044_v60, 16  ;;  %v2857_v3 = vshll.u32 %v5620_v53, 16  ;;  %v5665_v60 = vld [vmem:[%s6108_s1 + $0x1c] sm:$0xf] }
  0xee   : > { %4252 = vmatpush3.bf16.xpose.msra.mxu1 %v2329_v8  ;;  %4357 = vmatprep.subr.msk.bf16.mxu0 %vm739_vm0, %v4469_v15  ;;  %v3056_v25 = vor.u32 %v3055_v34, %v3051_v5  ;;  %v2850_v55 = vrot.slane %v2848_v26, 4  ;;  %v2861_v45 = vshrl.u32 %v5620_v53, 16  ;;  %v2867_v0 = vshll.u32 %v5623_v19, 16  ;;  %v4062_v43 = vld [vmem:[%s4666_s11 + $0xb4] sm:$0xf] }
  0xef   : > { %v3047_v38 = vrot.slane %v3046_v46, 4  ;;  %v2853_v51 = vrot.slane %v2851_v57, 5  ;;  %v2859_v41 = vrot.slane %v2857_v3, 5  ;;  %v5637_v62 = vsel %vm739_vm0, %v4472_v36, 0  ;;  %v5691_v46 = vld [vmem:[%s4666_s11 + $0xb8] sm:$0xf] }
  0xf0   : > { %v3057_v9 = vrot.slane %v3056_v25, 4  ;;  %v2863_v29 = vrot.slane %v2861_v45, 4  ;;  %v2869_v11 = vrot.slane %v2867_v0, 5  ;;  %v3016_v21 = vshrl.u32 %v4065_v16, 16  ;;  %v5697_v25 = vld [vmem:[%s4666_s11 + $0xbc] sm:$0x1] }
  0xf1   : > { %v3052_v56 = vsel %vm4694_vm3, %v3047_v38, %v3051_v5  ;;  %v2854_v18 = vor.u32 %v2853_v51, %v2850_v55  ;;  %v3019_v6 = vshll.u32 %v4065_v16, 16  ;;  %v3025_v23 = vshll.u32 %v5634_v42, 16  ;;  %v4473_v51 = vld [vmem:[%s4666_s11 + $0xb4] sm:$0xff]  }
  0xf2   : > { %v3062_v7 = vsel %vm4694_vm3, %v3057_v9, %v3061_v54  ;;  %v2864_v17 = vor.u32 %v2863_v29, %v2859_v41  ;;  %v3018_v47 = vrot.slane %v3016_v21, 4  ;;  %v3029_v14 = vshrl.u32 %v5634_v42, 16  ;;  %v4038_v9 = vld [vmem:[%s4666_s11 + $0x54] sm:$0xf] }
  0xf3   : > { %v4087_v12 = vcombine.low %v3052_v56, %v3062_v7  ;;  %v2855_v22 = vrot.slane %v2854_v18, 4  ;;  %v3021_v49 = vrot.slane %v3019_v6, 5  ;;  %v3027_v1 = vrot.slane %v3025_v23, 5  ;;  %v5707_v7 = vld [vmem:[%s4666_s11 + $0x58] sm:$0xf] }
  0xf4   : > { %4236 = vmatmul.mubr.msk.bf16.vlgmr.msra.gmra.mxu0 %vm739_vm0, %v5420_v32  ;;  %v2865_v59 = vrot.slane %v2864_v17, 4  ;;  %v3031_v40 = vrot.slane %v3029_v14, 4  ;;  %v3035_v20 = vshll.u32 %v5642_v4, 16  ;;  %v2824_v13 = vshrl.u32 %v4041_v35, 16 }
  0xf5   : > { %4256 = vmatpush3.bf16.xpose.msra.mxu0 %v5599_v2  ;;  %4254 = vmatmul.mubr.msk.bf16.vlgmr.msra.gmra.mxu1 %vm739_vm0, %v5388_v33  ;;  %v2860_v52 = vsel %vm4694_vm3, %v2855_v22, %v2859_v41  ;;  %v3022_v32 = vor.u32 %v3021_v49, %v3018_v47  ;;  %v2827_v15 = vshll.u32 %v4041_v35, 16  ;;  %v2833_v44 = vshll.u32 %v5651_v63, 16  ;;  %v5714_v47 = vld [vmem:[%s4666_s11 + $0x5c] sm:$0x1] }
  0xf6   : > { %4365 = vmatprep.subr.msk.bf16.mxu1 %vm739_vm0, %v4087_v12  ;;  %v2870_v10 = vsel %vm4694_vm3, %v2865_v59, %v2869_v11  ;;  %4358 = vmatprep.subr.msk.bf16.mxu0 %vm739_vm0, %v4471_v61  ;;  %v3032_v2 = vor.u32 %v3031_v40, %v3027_v1  ;;  %v3037_v37 = vrot.slane %v3035_v20, 5  ;;  %v2826_v33 = vrot.slane %v2824_v13, 4  ;;  %v4476_v59 = vld [vmem:[%s4666_s11 + $0x48] sm:$0xff]  }
  0xf7   : > { %v4079_v58 = vcombine.low %v2860_v52, %v2870_v10  ;;  %v3023_v5 = vrot.slane %v3022_v32, 4  ;;  %v2829_v36 = vrot.slane %v2827_v15, 5  ;;  %v2835_v31 = vrot.slane %v2833_v44, 5  ;;  %4271 = vmatprep.mubr.msk.bf16.mxu0 %vm739_vm0, %v5657_v30  ;;  %4289 = vmatprep.mubr.msk.bf16.mxu1 %vm739_vm0, %v5665_v60  ;;  %v4059_v10 = vld [vmem:[%s4666_s11 + $0xa8] sm:$0xf] }
  0xf8   : > { %v3033_v34 = vrot.slane %v3032_v2, 4  ;;  %v2837_v54 = vshrl.u32 %v5651_v63, 16  ;;  %v2843_v26 = vshll.u32 %v5673_v24, 16  ;;  %v5688_v8 = vsel %vm739_vm0, %v4474_v39, 0 }
  0xf9   : > { %v3138_v57 = vsel %vm739_vm0, %v4079_v58, 0  ;;  %v3028_v3 = vsel %vm4694_vm3, %v3023_v5, %v3027_v1  ;;  %v2830_v16 = vor.u32 %v2829_v36, %v2826_v33  ;;  %v2992_v55 = vshrl.u32 %v4062_v43, 16  ;;  %v5725_v58 = vld [vmem:[%s4666_s11 + $0xac] sm:$0xf] }
  0xfa   : > { %4274 = vmatpush3.bf16.xpose.msra.mxu1 %v3138_v57  ;;  %v3038_v45 = vsel %vm4694_vm3, %v3033_v34, %v3037_v37  ;;  %v2839_v0 = vrot.slane %v2837_v54, 4  ;;  %v2845_v38 = vrot.slane %v2843_v26, 5  ;;  %v2995_v41 = vshll.u32 %v4062_v43, 16  ;;  %v4475_v34 = vld [vmem:[%s4666_s11 + $0xa8] sm:$0xff]   ;;  %v5732_v26 = vld [vmem:[%s4666_s11 + $0xb0] sm:$0x1] }
  0xfb   : > { %v4086_v29 = vcombine.low %v3028_v3, %v3038_v45  ;;  %v2831_v11 = vrot.slane %v2830_v16, 4  ;;  %v2994_v21 = vrot.slane %v2992_v55, 4  ;;  %v3001_v56 = vshll.u32 %v5691_v46, 16  ;;  %v4035_v45 = vld [vmem:[%s4666_s11 + $0x48] sm:$0xf] }
  0xfc   : > { %v2840_v18 = vor.u32 %v2839_v0, %v2835_v31  ;;  %v2997_v6 = vrot.slane %v2995_v41, 5  ;;  %v3005_v23 = vshrl.u32 %v5691_v46, 16  ;;  %v3011_v35 = vshll.u32 %v5697_v25, 16 }
  0xfd   : > { %4258 = vmatpush3.bf16.xpose.msra.mxu0 %v5637_v62  ;;  %4366 = vmatprep.subr.msk.bf16.mxu1 %vm739_vm0, %v4086_v29  ;;  %v2836_v17 = vsel %vm4694_vm3, %v2831_v11, %v2835_v31  ;;  %v3003_v61 = vrot.slane %v3001_v56, 5  ;;  %v2800_v14 = vshrl.u32 %v4038_v9, 16  ;;  %v2803_v12 = vshll.u32 %v4038_v9, 16  ;;  %v5741_v9 = vld [vmem:[%s4666_s11 + $0x4c] sm:$0xf] }
  0xfe   : > { %v2841_v22 = vrot.slane %v2840_v18, 4  ;;  %4359 = vmatprep.subr.msk.bf16.mxu0 %vm739_vm0, %v4473_v51  ;;  %v2998_v49 = vor.u32 %v2997_v6, %v2994_v21  ;;  %v3007_v1 = vrot.slane %v3005_v23, 4  ;;  %v3013_v39 = vrot.slane %v3011_v35, 5 }
  0xff   : > { %v2802_v62 = vrot.slane %v2800_v14, 4  ;;  %v2805_v40 = vrot.slane %v2803_v12, 5  ;;  %v2809_v20 = vshll.u32 %v5707_v7, 16  ;;  %v2813_v13 = vshrl.u32 %v5707_v7, 16 }
 0x100   : > { %v2846_v52 = vsel %vm4694_vm3, %v2841_v22, %v2845_v38  ;;  %v2999_v32 = vrot.slane %v2998_v49, 4  ;;  %v3008_v15 = vor.u32 %v3007_v1, %v3003_v61  ;;  %v2819_v44 = vshll.u32 %v5714_v47, 16  ;;  %v4478_v22 = vld [vmem:[%s4666_s11 + $0x3c] sm:$0xff]  }
 0x101   : > { %v4078_v2 = vcombine.low %v2836_v17, %v2846_v52  ;;  %v2806_v37 = vor.u32 %v2805_v40, %v2802_v62  ;;  %v2811_v33 = vrot.slane %v2809_v20, 5  ;;  %v2815_v43 = vrot.slane %v2813_v13, 4  ;;  %v5752_v17 = vld [vmem:[%s4666_s11 + $0x50] sm:$0x1]  ;;  %v4056_v62 = vld [vmem:[%s4666_s11 + $0x9c] sm:$0xf] }
 0x102   : > { %v3004_v5 = vsel %vm4694_vm3, %v2999_v32, %v3003_v61  ;;  %v3009_v36 = vrot.slane %v3008_v15, 4  ;;  %v2821_v31 = vrot.slane %v2819_v44, 5  ;;  %v2553_v54 = vsel %vm739_vm0, %v4476_v59, 0  ;;  %v4477_v32 = vld [vmem:[%s4666_s11 + $0x9c] sm:$0xff]  }
 0x103   : > { %v3135_v57 = vsel %vm739_vm0, %v4078_v2, 0  ;;  %v2807_v3 = vrot.slane %v2806_v37, 4  ;;  %v2816_v16 = vor.u32 %v2815_v43, %v2811_v33  ;;  %v2968_v55 = vshrl.u32 %v4059_v10, 16  ;;  %v5762_v37 = vld [vmem:[%s4666_s11 + $0xa0] sm:$0xf] }
 0x104   : > { %4276 = vmatpush3.bf16.xpose.msra.mxu1 %v3135_v57  ;;  %v3014_v0 = vsel %vm4694_vm3, %v3009_v36, %v3013_v39  ;;  %v2971_v38 = vshll.u32 %v4059_v10, 16  ;;  %v2977_v51 = vshll.u32 %v5725_v58, 16  ;;  %v2981_v41 = vshrl.u32 %v5725_v58, 16  ;;  %v5766_v36 = vld [vmem:[%s4666_s11 + $0xa4] sm:$0x1] }
 0x105   : > { %4260 = vmatpush3.bf16.xpose.msra.mxu0 %v5688_v8  ;;  %v4085_v29 = vcombine.low %v3004_v5, %v3014_v0  ;;  %v2812_v11 = vsel %vm4694_vm3, %v2807_v3, %v2811_v33  ;;  %v2817_v21 = vrot.slane %v2816_v16, 4  ;;  %v2970_v56 = vrot.slane %v2968_v55, 4  ;;  %v4032_v55 = vld [vmem:[%s4666_s11 + $0x3c] sm:$0xf] }
 0x106   : > { %4360 = vmatprep.subr.msk.bf16.mxu0 %vm739_vm0, %v4475_v34  ;;  %v2973_v18 = vrot.slane %v2971_v38, 5  ;;  %v2979_v6 = vrot.slane %v2977_v51, 5  ;;  %v2983_v23 = vrot.slane %v2981_v41, 4  ;;  %v2987_v35 = vshll.u32 %v5732_v26, 16 }
 0x107   : > { %4367 = vmatprep.subr.msk.bf16.mxu1 %vm739_vm0, %v4085_v29  ;;  %v2822_v8 = vsel %vm4694_vm3, %v2817_v21, %v2821_v31  ;;  %v2776_v61 = vshrl.u32 %v4035_v45, 16  ;;  %v2779_v14 = vshll.u32 %v4035_v45, 16  ;;  %v2785_v12 = vshll.u32 %v5741_v9, 16 }
 0x108   : > { %v4077_v49 = vcombine.low %v2812_v11, %v2822_v8  ;;  %v2974_v1 = vor.u32 %v2973_v18, %v2970_v56  ;;  %v2984_v39 = vor.u32 %v2983_v23, %v2979_v6  ;;  %v2989_v59 = vrot.slane %v2987_v35, 5  ;;  %v5778_v56 = vld [vmem:[%s4666_s11 + $0x40] sm:$0xf]  ;;  %v4480_v35 = vld [vmem:[%s4666_s11 + $0x30] sm:$0xff]  }
 0x109   : > { %v2778_v40 = vrot.slane %v2776_v61, 4  ;;  %v2781_v20 = vrot.slane %v2779_v14, 5  ;;  %v2787_v13 = vrot.slane %v2785_v12, 5  ;;  %v2789_v52 = vshrl.u32 %v5741_v9, 16 }
 0x10a   : > { %v3132_v15 = vsel %vm739_vm0, %v4077_v49, 0  ;;  %v2975_v44 = vrot.slane %v2974_v1, 4  ;;  %v2985_v10 = vrot.slane %v2984_v39, 4  ;;  %v2795_v2 = vshll.u32 %v5752_v17, 16 }
 0x10b   : > { %v2782_v33 = vor.u32 %v2781_v20, %v2778_v40  ;;  %v2791_v43 = vrot.slane %v2789_v52, 4  ;;  %v2550_v5 = vsel %vm739_vm0, %v4478_v22, 0  ;;  %v2944_v31 = vshrl.u32 %v4056_v62, 16  ;;  %v5785_v22 = vld [vmem:[%s4666_s11 + $0x44] sm:$0x1]  ;;  %v4479_v52 = vld [vmem:[%s4666_s11 + $0x90] sm:$0xff]  }
 0x10c   : > { %4278 = vmatpush3.bf16.xpose.msra.mxu1 %v3132_v15  ;;  %v2980_v34 = vsel %vm4694_vm3, %v2975_v44, %v2979_v6  ;;  %v2990_v57 = vsel %vm4694_vm3, %v2985_v10, %v2989_v59  ;;  %v2797_v3 = vrot.slane %v2795_v2, 5  ;;  %v2947_v16 = vshll.u32 %v4056_v62, 16 }
 0x10d   : > { %4262 = vmatpush3.bf16.xpose.msra.mxu0 %v2553_v54  ;;  %v4084_v45 = vcombine.low %v2980_v34, %v2990_v57  ;;  %v2783_v0 = vrot.slane %v2782_v33, 4  ;;  %v2792_v38 = vor.u32 %v2791_v43, %v2787_v13  ;;  %v2946_v51 = vrot.slane %v2944_v31, 4  ;;  %v5796_v33 = vld [vmem:[%s4666_s11 + $0x94] sm:$0xf] }
 0x10e   : > { %4361 = vmatprep.subr.msk.bf16.mxu0 %vm739_vm0, %v4477_v32  ;;  %v2949_v41 = vrot.slane %v2947_v16, 5  ;;  %v2953_v29 = vshll.u32 %v5762_v37, 16  ;;  %v2957_v11 = vshrl.u32 %v5762_v37, 16  ;;  %v2963_v21 = vshll.u32 %v5766_v36, 16  ;;  %v4053_v32 = vld [vmem:[%s4666_s11 + $0x90] sm:$0xf] }
 0x10f   : > { %4368 = vmatprep.subr.msk.bf16.mxu1 %vm739_vm0, %v4084_v45  ;;  %v2788_v54 = vsel %vm4694_vm3, %v2783_v0, %v2787_v13  ;;  %v2793_v18 = vrot.slane %v2792_v38, 4  ;;  %v2752_v6 = vshrl.u32 %v4032_v55, 16  ;;  %v2755_v23 = vshll.u32 %v4032_v55, 16  ;;  %v5802_v55 = vld [vmem:[%s4666_s11 + $0x98] sm:$0x1] }
 0x110   : > { %v2950_v8 = vor.u32 %v2949_v41, %v2946_v51  ;;  %v2955_v61 = vrot.slane %v2953_v29, 5  ;;  %v2959_v14 = vrot.slane %v2957_v11, 4  ;;  %v2965_v12 = vrot.slane %v2963_v21, 5  ;;  %v4029_v11 = vld [vmem:[%s4666_s11 + $0x30] sm:$0xf] }
 0x111   : > { %v2798_v49 = vsel %vm4694_vm3, %v2793_v18, %v2797_v3  ;;  %v2754_v1 = vrot.slane %v2752_v6, 4  ;;  %v2757_v39 = vrot.slane %v2755_v23, 5  ;;  %v2761_v59 = vshll.u32 %v5778_v56, 16 }
 0x112   : > { %v4076_v62 = vcombine.low %v2788_v54, %v2798_v49  ;;  %v2951_v40 = vrot.slane %v2950_v8, 4  ;;  %v2960_v20 = vor.u32 %v2959_v14, %v2955_v61  ;;  %v2765_v13 = vshrl.u32 %v5778_v56, 16 }
 0x113   : > { %v2758_v15 = vor.u32 %v2757_v39, %v2754_v1  ;;  %v2763_v44 = vrot.slane %v2761_v59, 5  ;;  %v2771_v10 = vshll.u32 %v5785_v22, 16  ;;  %v2547_v2 = vsel %vm739_vm0, %v4480_v35, 0  ;;  %v4482_v59 = vld [vmem:[%s4666_s11 + $0x24] sm:$0xff]  }
 0x114   : > { %v3129_v43 = vsel %vm739_vm0, %v4076_v62, 0  ;;  %v2956_v31 = vsel %vm4694_vm3, %v2951_v40, %v2955_v61  ;;  %v2961_v34 = vrot.slane %v2960_v20, 4  ;;  %v2767_v57 = vrot.slane %v2765_v13, 4 }
 0x115   : > { %4280 = vmatpush3.bf16.xpose.msra.mxu1 %v3129_v43  ;;  %4264 = vmatpush3.bf16.xpose.msra.mxu0 %v2550_v5  ;;  %v2759_v3 = vrot.slane %v2758_v15, 4  ;;  %v2773_v16 = vrot.slane %v2771_v10, 5  ;;  %v2920_v45 = vshrl.u32 %v4053_v32, 16  ;;  %v2923_v0 = vshll.u32 %v4053_v32, 16  ;;  %v5811_v5 = vld [vmem:[%s4666_s11 + $0x34] sm:$0xf] }
 0x116   : > { %v2966_v38 = vsel %vm4694_vm3, %v2961_v34, %v2965_v12  ;;  %v2768_v51 = vor.u32 %v2767_v57, %v2763_v44  ;;  %4362 = vmatprep.subr.msk.bf16.mxu0 %vm739_vm0, %v4479_v52  ;;  %v2929_v41 = vshll.u32 %v5796_v33, 16  ;;  %v2933_v29 = vshrl.u32 %v5796_v33, 16  ;;  %v5818_v12 = vld [vmem:[%s4666_s11 + $0x38] sm:$0x1]  ;;  %v4481_v52 = vld [vmem:[%s4666_s11 + $0x84] sm:$0xff]  }
 0x117   : > { %v4083_v21 = vcombine.low %v2956_v31, %v2966_v38  ;;  %v2764_v54 = vsel %vm4694_vm3, %v2759_v3, %v2763_v44  ;;  %v2922_v18 = vrot.slane %v2920_v45, 4  ;;  %v2925_v6 = vrot.slane %v2923_v0, 5  ;;  %v4050_v43 = vld [vmem:[%s4666_s11 + $0x84] sm:$0xf]  ;;  %v5829_v45 = vld [vmem:[%s4666_s11 + $0x88] sm:$0xf] }
 0x118   : > { %v2769_v23 = vrot.slane %v2768_v51, 4  ;;  %v2931_v35 = vrot.slane %v2929_v41, 5  ;;  %v2935_v8 = vrot.slane %v2933_v29, 4  ;;  %v2939_v61 = vshll.u32 %v5802_v55, 16  ;;  %v5836_v41 = vld [vmem:[%s4666_s11 + $0x8c] sm:$0x1] }
 0x119   : > { %4369 = vmatprep.subr.msk.bf16.mxu1 %vm739_vm0, %v4083_v21  ;;  %v2926_v14 = vor.u32 %v2925_v6, %v2922_v18  ;;  %v2728_v49 = vshrl.u32 %v4029_v11, 16  ;;  %v2731_v1 = vshll.u32 %v4029_v11, 16  ;;  %v2737_v39 = vshll.u32 %v5811_v5, 16 }
 0x11a   : > { %v2774_v62 = vsel %vm4694_vm3, %v2769_v23, %v2773_v16  ;;  %v2936_v40 = vor.u32 %v2935_v8, %v2931_v35  ;;  %v2941_v20 = vrot.slane %v2939_v61, 5  ;;  %v2741_v13 = vshrl.u32 %v5811_v5, 16 }
 0x11b   : > { %v4075_v32 = vcombine.low %v2764_v54, %v2774_v62  ;;  %v2927_v15 = vrot.slane %v2926_v14, 4  ;;  %v2730_v44 = vrot.slane %v2728_v49, 4  ;;  %v2733_v10 = vrot.slane %v2731_v1, 5  ;;  %v5846_v1 = vld [vmem:[%s4666_s11 + $0x28] sm:$0xf] }
 0x11c   : > { %v2937_v31 = vrot.slane %v2936_v40, 4  ;;  %v2739_v34 = vrot.slane %v2737_v39, 5  ;;  %v2743_v57 = vrot.slane %v2741_v13, 4  ;;  %v2747_v3 = vshll.u32 %v5818_v12, 16  ;;  %v5852_v40 = vld [vmem:[%s4666_s11 + $0x2c] sm:$0x1] }
 0x11d   : > { %v3126_v16 = vsel %vm739_vm0, %v4075_v32, 0  ;;  %4266 = vmatpush3.bf16.xpose.msra.mxu0 %v2547_v2  ;;  %v2932_v0 = vsel %vm4694_vm3, %v2927_v15, %v2931_v35  ;;  %v2734_v38 = vor.u32 %v2733_v10, %v2730_v44  ;;  %v2544_v51 = vsel %vm739_vm0, %v4482_v59, 0  ;;  %v4026_v2 = vld [vmem:[%s4666_s11 + $0x24] sm:$0xf]  ;;  %v4484_v13 = vld [vmem:[%s4666_s11 + $0x18] sm:$0xff]  }
 0x11e   : > { %4282 = vmatpush3.bf16.xpose.msra.mxu1 %v3126_v16  ;;  %v2942_v29 = vsel %vm4694_vm3, %v2937_v31, %v2941_v20  ;;  %v2744_v11 = vor.u32 %v2743_v57, %v2739_v34  ;;  %v2749_v21 = vrot.slane %v2747_v3, 5  ;;  %4363 = vmatprep.subr.msk.bf16.mxu0 %vm739_vm0, %v4481_v52  ;;  %v2896_v54 = vshrl.u32 %v4050_v43, 16  ;;  %v4483_v10 = vld [vmem:[%s4666_s11 + $0x78] sm:$0xff]  }
 0x11f   : > { %v4082_v18 = vcombine.low %v2932_v0, %v2942_v29  ;;  %v2735_v6 = vrot.slane %v2734_v38, 4  ;;  %v2899_v23 = vshll.u32 %v4050_v43, 16  ;;  %v2905_v35 = vshll.u32 %v5829_v45, 16 }
 0x120   : > { %v2745_v8 = vrot.slane %v2744_v11, 4  ;;  %v2898_v61 = vrot.slane %v2896_v54, 4  ;;  %v2909_v14 = vshrl.u32 %v5829_v45, 16  ;;  %v2915_v49 = vshll.u32 %v5836_v41, 16  ;;  %v5863_v11 = vld [vmem:[%s4666_s11 + $0x7c] sm:$0xf] }
 0x121   : > { %4370 = vmatprep.subr.msk.bf16.mxu1 %vm739_vm0, %v4082_v18  ;;  %v2740_v39 = vsel %vm4694_vm3, %v2735_v6, %v2739_v34  ;;  %v2901_v59 = vrot.slane %v2899_v23, 5  ;;  %v2907_v62 = vrot.slane %v2905_v35, 5  ;;  %v2704_v20 = vshrl.u32 %v4026_v2, 16  ;;  %v4047_v34 = vld [vmem:[%s4666_s11 + $0x78] sm:$0xf] }
 0x122   : > { %v2750_v52 = vsel %vm4694_vm3, %v2745_v8, %v2749_v21  ;;  %v2911_v32 = vrot.slane %v2909_v14, 4  ;;  %v2917_v15 = vrot.slane %v2915_v49, 5  ;;  %v2707_v44 = vshll.u32 %v4026_v2, 16  ;;  %v5871_v14 = vld [vmem:[%s4666_s11 + $0x80] sm:$0x1] }
 0x123   : > { %v4074_v43 = vcombine.low %v2740_v39, %v2750_v52  ;;  %v2902_v31 = vor.u32 %v2901_v59, %v2898_v61  ;;  %v2706_v57 = vrot.slane %v2704_v20, 4  ;;  %v2713_v3 = vshll.u32 %v5846_v1, 16 }
 0x124   : > { %v2912_v16 = vor.u32 %v2911_v32, %v2907_v62  ;;  %v2709_v0 = vrot.slane %v2707_v44, 5  ;;  %v2717_v38 = vshrl.u32 %v5846_v1, 16  ;;  %v2723_v29 = vshll.u32 %v5852_v40, 16  ;;  %v4023_v32 = vld [vmem:[%s4666_s11 + $0x18] sm:$0xf] }
 0x125   : > { %v3123_v21 = vsel %vm739_vm0, %v4074_v43, 0  ;;  %4268 = vmatpush3.bf16.xpose.msra.mxu0 %v2544_v51  ;;  %v2903_v54 = vrot.slane %v2902_v31, 4  ;;  %v2715_v2 = vrot.slane %v2713_v3, 5  ;;  %v2541_v18 = vsel %vm739_vm0, %v4484_v13, 0  ;;  %v5879_v44 = vld [vmem:[%s4666_s11 + $0x1c] sm:$0xf] }
 0x126   : > { %4284 = vmatpush3.bf16.xpose.msra.mxu1 %v3123_v21  ;;  %v2913_v6 = vrot.slane %v2912_v16, 4  ;;  %v2710_v23 = vor.u32 %v2709_v0, %v2706_v57  ;;  %v2719_v35 = vrot.slane %v2717_v38, 4  ;;  %v2725_v8 = vrot.slane %v2723_v29, 5  ;;  %4364 = vmatprep.subr.msk.bf16.mxu0 %vm739_vm0, %v4483_v10  ;;  %v5886_v0 = vld [vmem:[%s4666_s11 + $0x20] sm:$0x1] }
 0x127   : > { %v2908_v61 = vsel %vm4694_vm3, %v2903_v54, %v2907_v62  ;;  %v2872_v49 = vshrl.u32 %v4047_v34, 16  ;;  %v2875_v51 = vshll.u32 %v4047_v34, 16  ;;  %v2881_v39 = vshll.u32 %v5863_v11, 16 }
 0x128   : > { %v2918_v59 = vsel %vm4694_vm3, %v2913_v6, %v2917_v15  ;;  %v2711_v20 = vrot.slane %v2710_v23, 4  ;;  %v2720_v13 = vor.u32 %v2719_v35, %v2715_v2  ;;  %v2885_v52 = vshrl.u32 %v5863_v11, 16  ;;  %v4104_v35 = vld [vmem:[%s4666_s11 + $0xcc] sm:$0xe] }
 0x129   : > { %v4081_v10 = vcombine.low %v2908_v61, %v2918_v59  ;;  %v2874_v43 = vrot.slane %v2872_v49, 4  ;;  %v2877_v62 = vrot.slane %v2875_v51, 5  ;;  %v2883_v31 = vrot.slane %v2881_v39, 5 }
 0x12a   : > { %v2716_v57 = vsel %vm4694_vm3, %v2711_v20, %v2715_v2  ;;  %v2721_v3 = vrot.slane %v2720_v13, 4  ;;  %v2887_v34 = vrot.slane %v2885_v52, 4  ;;  %v2891_v15 = vshll.u32 %v5871_v14, 16 }
 0x12b   : > { %4371 = vmatprep.subr.msk.bf16.mxu1 %vm739_vm0, %v4081_v10  ;;  %v2878_v16 = vor.u32 %v2877_v62, %v2874_v43  ;;  %v2680_v38 = vshrl.u32 %v4023_v32, 16  ;;  %v2683_v29 = vshll.u32 %v4023_v32, 16  ;;  %v2689_v21 = vshll.u32 %v5879_v44, 16  ;;  %v4096_v10 = vld [vmem:[%s4666_s11 + $0x6c] sm:$0xe] }
 0x12c   : > { %v2726_v54 = vsel %vm4694_vm3, %v2721_v3, %v2725_v8  ;;  %v2888_v6 = vor.u32 %v2887_v34, %v2883_v31  ;;  %v2893_v23 = vrot.slane %v2891_v15, 5  ;;  %v2693_v2 = vshrl.u32 %v5879_v44, 16 }
 0x12d   : > { %v4073_v61 = vcombine.low %v2716_v57, %v2726_v54  ;;  %4270 = vmatpush3.bf16.xpose.msra.mxu0 %v2541_v18  ;;  %v2879_v49 = vrot.slane %v2878_v16, 4  ;;  %v2682_v51 = vrot.slane %v2680_v38, 4  ;;  %v2685_v39 = vrot.slane %v2683_v29, 5  ;;  %v997_v59 = vpop.f32.mrf.mxu1  ;;  %v4103_v38 = vld [vmem:[%s4666_s11 + $0xc0] sm:$0xe] }
 0x12e   : > { %v2889_v20 = vrot.slane %v2888_v6, 4  ;;  %v2691_v13 = vrot.slane %v2689_v21, 5  ;;  %v2695_v52 = vrot.slane %v2693_v2, 4  ;;  %v2699_v32 = vshll.u32 %v5886_v0, 16 }
 0x12f   : > { %v3120_v8 = vsel %vm739_vm0, %v4073_v61, 0  ;;  %v2884_v43 = vsel %vm4694_vm3, %v2879_v49, %v2883_v31  ;;  %v2686_v62 = vor.u32 %v2685_v39, %v2682_v51  ;;  %v4120_v3 = vrot.slane %v4104_v35, 9  ;;  %v999_v57 = vpop.f32.mrf.mxu1 }
 0x130   : > { %4286 = vmatpush3.bf16.xpose.msra.mxu1 %v3120_v8  ;;  %v2894_v18 = vsel %vm4694_vm3, %v2889_v20, %v2893_v23  ;;  %v2696_v34 = vor.u32 %v2695_v52, %v2691_v13  ;;  %v2701_v15 = vrot.slane %v2699_v32, 5  ;;  %v3378_v16 = vrot.slane %v5594_v27, 5  ;;  %v5909_v23 = vld [vmem:[%s6108_s1 + $0x20] sm:$0xf] }
 0x131   : > { %v4080_v29 = vcombine.low %v2884_v43, %v2894_v18  ;;  %v2687_v21 = vrot.slane %v2686_v62, 4  ;;  %v3381_v54 = vrot.slane %v5602_v50, 5  ;;  %v4112_v6 = vrot.slane %v4096_v10, 9  ;;  %v1001_v2 = vpop.f32.mrf.mxu1  ;;  %v4095_v52 = vld [vmem:[%s4666_s11 + $0x60] sm:$0xe] }
 0x132   : > { %v2697_v31 = vrot.slane %v2696_v34, 4  ;;  %v3379_v35 = vsel %vm4947_vm6, %v4120_v3, %v3378_v16  ;;  %v3380_v61 = vrot.slane %v3378_v16, 4  ;;  %v3322_v49 = vrot.slane %v5620_v53, 5  ;;  %v4102_v3 = vld [vmem:[%s4666_s11 + $0xb4] sm:$0xe] }
 0x133   : > { %4372 = vmatprep.subr.msk.bf16.mxu1 %vm739_vm0, %v4080_v29  ;;  %v2692_v27 = vsel %vm4694_vm3, %v2687_v21, %v2691_v13  ;;  %v825_v50 = vpop.f32.mrf.mxu0  ;;  %v3325_v51 = vrot.slane %v5623_v19, 5  ;;  %v4119_v39 = vrot.slane %v4103_v38, 9  ;;  %v3371_v20 = vrot.slane %v5634_v42, 5  ;;  %v1002_v32 = vpop.f32.mrf.mxu1 }
 0x134   : > { %v2702_v53 = vsel %vm4694_vm3, %v2697_v31, %v2701_v15  ;;  %v5919_v10 = vadd.f32 %v997_v59, %v825_v50  ;;  %4272 = vmatmul.mubr.msk.bf16.vlgmr.msra.gmra.mxu0 %vm739_vm0, %v5657_v30  ;;  %v3382_v13 = vsel %vm4947_vm6, %v3380_v61, %v3381_v54  ;;  %v3323_v8 = vsel %vm4947_vm6, %v4112_v6, %v3322_v49  ;;  %v4094_v54 = vld [vmem:[%s4666_s11 + $0x54] sm:$0xe] }
 0x135   : > { %v4072_v19 = vcombine.low %v2692_v27, %v2702_v53  ;;  %v4137_v43 = vcombine.low %v3379_v35, %v3382_v13  ;;  %v3324_v42 = vrot.slane %v3322_v49, 4  ;;  %v827_v62 = vpop.f32.mrf.mxu0  ;;  %v3372_v28 = vsel %vm4947_vm6, %v4119_v39, %v3371_v20  ;;  %4307 = vmatprep.mubr.msk.bf16.mxu0 %vm739_vm0, %v5909_v23 }
 0x136   : > { %v5932_v59 = vadd.f32 %v999_v57, %v827_v62  ;;  %v3373_v30 = vrot.slane %v3371_v20, 4  ;;  %v3374_v18 = vrot.slane %v5642_v4, 5  ;;  %v4111_v34 = vrot.slane %v4095_v52, 9 }
 0x137   : > { %v3117_v15 = vsel %vm739_vm0, %v4072_v19, 0  ;;  %4373 = vmatprep.subr.msk.bf16.mxu0 %vm739_vm0, %v4137_v43  ;;  %v3326_v16 = vsel %vm4947_vm6, %v3324_v42, %v3325_v51  ;;  %v829_v38 = vpop.f32.mrf.mxu0  ;;  %v3315_v29 = vrot.slane %v5651_v63, 5  ;;  %v3318_v21 = vrot.slane %v5673_v24, 5  ;;  %v4093_v51 = vld [vmem:[%s4666_s11 + $0x48] sm:$0xe] }
 0x138   : > { %4288 = vmatpush3.bf16.xpose.msra.mxu1 %v3117_v15  ;;  %v4129_v57 = vcombine.low %v3323_v8, %v3326_v16  ;;  %v3375_v4 = vsel %vm4947_vm6, %v3373_v30, %v3374_v18  ;;  %v4118_v6 = vrot.slane %v4102_v3, 9  ;;  %v3364_v2 = vrot.slane %v5691_v46, 5  ;;  %v4101_v43 = vld [vmem:[%s4666_s11 + $0xa8] sm:$0xe]  ;;  %v4100_v38 = vld [vmem:[%s4666_s11 + $0x9c] sm:$0xe] }
 0x139   : > { %v830_v31 = vpop.f32.mrf.mxu0  ;;  %v4136_v35 = vcombine.low %v3372_v28, %v3375_v4  ;;  %v3316_v61 = vsel %vm4947_vm6, %v4111_v34, %v3315_v29  ;;  %v3317_v49 = vrot.slane %v3315_v29, 4  ;;  %v3367_v63 = vrot.slane %v5697_v25, 5 }
 0x13a   : > { %v3458_v27 = vsel %vm739_vm0, %v4129_v57, 0  ;;  %v3366_v24 = vrot.slane %v3364_v2, 4  ;;  %v4110_v50 = vrot.slane %v4094_v54, 9  ;;  %v3308_v46 = vrot.slane %v5707_v7, 5 }
 0x13b   : > { %4292 = vmatpush3.bf16.xpose.msra.mxu0 %v3458_v27  ;;  %v3319_v39 = vsel %vm4947_vm6, %v3317_v49, %v3318_v21  ;;  %v3311_v20 = vrot.slane %v5714_v47, 5  ;;  %v3365_v25 = vsel %vm4947_vm6, %v4118_v6, %v3364_v2  ;;  %v3357_v8 = vrot.slane %v5725_v58, 5  ;;  %v4092_v6 = vld [vmem:[%s4666_s11 + $0x3c] sm:$0xe] }
 0x13c   : > { %4374 = vmatprep.subr.msk.bf16.mxu0 %vm739_vm0, %v4136_v35  ;;  %v4128_v52 = vcombine.low %v3316_v61, %v3319_v39  ;;  %v3368_v32 = vsel %vm4947_vm6, %v3366_v24, %v3367_v63  ;;  %v3309_v53 = vsel %vm4947_vm6, %v4110_v50, %v3308_v46  ;;  %v3310_v13 = vrot.slane %v3308_v46, 4  ;;  %v4099_v63 = vld [vmem:[%s4666_s11 + $0x90] sm:$0xe] }
 0x13d   : > { %v4109_v19 = vrot.slane %v4093_v51, 9  ;;  %v3301_v7 = vrot.slane %v5741_v9, 5  ;;  %v4135_v47 = vcombine.low %v3365_v25, %v3368_v32  ;;  %v3304_v62 = vrot.slane %v5752_v17, 5 }
 0x13e   : > { %v3312_v42 = vsel %vm4947_vm6, %v3310_v13, %v3311_v20  ;;  %v3455_v28 = vsel %vm739_vm0, %v4128_v52, 0  ;;  %v4117_v18 = vrot.slane %v4101_v43, 9  ;;  %v3359_v9 = vrot.slane %v3357_v8, 4  ;;  %v4091_v20 = vld [vmem:[%s4666_s11 + $0x30] sm:$0xe] }
 0x13f   : > { %4290 = vmatmul.mubr.msk.bf16.vlgmr.msra.gmra.mxu1 %vm739_vm0, %v5665_v60  ;;  %v4127_v3 = vcombine.low %v3309_v53, %v3312_v42  ;;  %v3302_v58 = vsel %vm4947_vm6, %v4109_v19, %v3301_v7  ;;  %v3303_v30 = vrot.slane %v3301_v7, 4  ;;  %v3360_v34 = vrot.slane %v5732_v26, 5 }
 0x140   : > { %v3358_v17 = vsel %vm4947_vm6, %v4117_v18, %v3357_v8  ;;  %v3350_v29 = vrot.slane %v5762_v37, 5  ;;  %v4116_v54 = vrot.slane %v4100_v38, 9  ;;  %v3353_v4 = vrot.slane %v5766_v36, 5  ;;  %v4098_v8 = vld [vmem:[%s4666_s11 + $0x84] sm:$0xe] }
 0x141   : > { %v3305_v60 = vsel %vm4947_vm6, %v3303_v30, %v3304_v62  ;;  %v3361_v16 = vsel %vm4947_vm6, %v3359_v9, %v3360_v34  ;;  %v3452_v21 = vsel %vm739_vm0, %v4127_v3, 0  ;;  %v3294_v2 = vrot.slane %v5778_v56, 5  ;;  %v4097_v34 = vld [vmem:[%s4666_s11 + $0x78] sm:$0xe] }
 0x142   : > { %v4126_v15 = vcombine.low %v3302_v58, %v3305_v60  ;;  %v4134_v26 = vcombine.low %v3358_v17, %v3361_v16  ;;  %v3352_v57 = vrot.slane %v3350_v29, 4  ;;  %v3351_v31 = vsel %vm4947_vm6, %v4116_v54, %v3350_v29 }
 0x143   : > { %4294 = vmatpush3.bf16.xpose.msra.mxu0 %v3455_v28  ;;  %v4108_v35 = vrot.slane %v4092_v6, 9  ;;  %v3296_v61 = vrot.slane %v3294_v2, 4  ;;  %v3297_v49 = vrot.slane %v5785_v22, 5  ;;  %v3343_v36 = vrot.slane %v5796_v33, 5  ;;  %v4090_v28 = vld [vmem:[%s4666_s11 + $0x24] sm:$0xe] }
 0x144   : > { %4375 = vmatprep.subr.msk.bf16.mxu0 %vm739_vm0, %v4135_v47  ;;  %v3354_v37 = vsel %vm4947_vm6, %v3352_v57, %v3353_v4  ;;  %v3449_v27 = vsel %vm739_vm0, %v4126_v15, 0  ;;  %v4115_v50 = vrot.slane %v4099_v63, 9  ;;  %v3346_v46 = vrot.slane %v5802_v55, 5 }
 0x145   : > { %v4133_v56 = vcombine.low %v3351_v31, %v3354_v37  ;;  %v3295_v24 = vsel %vm4947_vm6, %v4108_v35, %v3294_v2  ;;  %v3298_v51 = vsel %vm4947_vm6, %v3296_v61, %v3297_v49  ;;  %v3345_v39 = vrot.slane %v3343_v36, 4 }
 0x146   : > { %v3287_v22 = vrot.slane %v5811_v5, 5  ;;  %v4125_v33 = vcombine.low %v3295_v24, %v3298_v51  ;;  %v3344_v52 = vsel %vm4947_vm6, %v4115_v50, %v3343_v36  ;;  %v4107_v25 = vrot.slane %v4091_v20, 9 }
 0x147   : > { %v3347_v32 = vsel %vm4947_vm6, %v3345_v39, %v3346_v46  ;;  %v3290_v13 = vrot.slane %v5818_v12, 5  ;;  %v3336_v55 = vrot.slane %v5829_v45, 5  ;;  %v4114_v7 = vrot.slane %v4098_v8, 9 }
 0x148   : > { %v3289_v53 = vrot.slane %v3287_v22, 4  ;;  %v3446_v5 = vsel %vm739_vm0, %v4125_v33, 0  ;;  %v4132_v19 = vcombine.low %v3344_v52, %v3347_v32  ;;  %v3288_v43 = vsel %vm4947_vm6, %v4107_v25, %v3287_v22 }
 0x149   : > { %v3338_v42 = vrot.slane %v3336_v55, 4  ;;  %v3339_v62 = vrot.slane %v5836_v41, 5  ;;  %v3280_v12 = vrot.slane %v5846_v1, 5  ;;  %v3337_v3 = vsel %vm4947_vm6, %v4114_v7, %v3336_v55 }
 0x14a   : > { %v3291_v47 = vsel %vm4947_vm6, %v3289_v53, %v3290_v13  ;;  %v4106_v58 = vrot.slane %v4090_v28, 9  ;;  %v3283_v9 = vrot.slane %v5852_v40, 5  ;;  %v3329_v41 = vrot.slane %v5863_v11, 5 }
 0x14b   : > { %4296 = vmatpush3.bf16.xpose.msra.mxu0 %v3452_v21  ;;  %v4124_v45 = vcombine.low %v3288_v43, %v3291_v47  ;;  %v3340_v30 = vsel %vm4947_vm6, %v3338_v42, %v3339_v62  ;;  %v3282_v18 = vrot.slane %v3280_v12, 4  ;;  %v4113_v17 = vrot.slane %v4097_v34, 9  ;;  %v4089_v21 = vld [vmem:[%s4666_s11 + $0x18] sm:$0xe]  ;;  %s207_s11 = sand.u32 1, %s4545_s16  }
 0x14c   : > { %4376 = vmatprep.subr.msk.bf16.mxu0 %vm739_vm0, %v4134_v26  ;;  %v4131_v60 = vcombine.low %v3337_v3, %v3340_v30  ;;  %v3281_v15 = vsel %vm4947_vm6, %v4106_v58, %v3280_v12  ;;  %v3331_v38 = vrot.slane %v3329_v41, 4  ;;  %v3332_v29 = vrot.slane %v5871_v14, 5  ;;  %s3734_s12 = sshll.u32 %s207_s11, 3  ;;  %s3551_s8 = scalar_lea.sflag [#allocation3], %s207_s11 }
 0x14d   : > { %v3443_v1 = vsel %vm739_vm0, %v4124_v45, 0  ;;  %v3284_v16 = vsel %vm4947_vm6, %v3282_v18, %v3283_v9  ;;  %v3273_v26 = vrot.slane %v5879_v44, 5  ;;  %v4105_v11 = vrot.slane %v4089_v21, 9  ;;  %s209_s13 = scalar_lea.vmem [#allocation2], %s3734_s12  ;;  %s4489_s12 = sshll.u32 %s4563_s10, 4  ;;  %s4490_s12 = int_to_ptr.vmem [resolvable:$false] %s4489_s12 }
 0x14e   : > { %v4123_v40 = vcombine.low %v3281_v15, %v3284_v16  ;;  %v3330_v54 = vsel %vm4947_vm6, %v4113_v17, %v3329_v41  ;;  %v3333_v57 = vsel %vm4947_vm6, %v3331_v38, %v3332_v29  ;;  %v3276_v6 = vrot.slane %v5886_v0, 5  ;;  %s3581_s6 = sshll.u32 %s209_s13, 4  ;;  %s4491_s21 = scalar_lea.vmem %s4490_s12, 256  ;;  %s3582_s6 = int_to_ptr.vmem [resolvable:$true] %s3581_s6 }
 0x14f   : > { %v3275_v4 = vrot.slane %v3273_v26, 4  ;;  %v4130_v14 = vcombine.low %v3330_v54, %v3333_v57  ;;  %v3274_v44 = vsel %vm4947_vm6, %v4105_v11, %v3273_v26  ;;  %s4485_s9 = scalar_lea.vmem %s3582_s6, 128  ;;  %p4492_p1 = scmp.lt.s32.totalorder %s3582_s6, %s4490_s12 }
 0x150   : > { %v3440_v2 = vsel %vm739_vm0, %v4123_v40, 0  ;;  %p4486_p12 = scmp.ne.s32.totalorder %s3582_s6, %s4485_s9  ;;  %p4493_p2 = scmp.lt.s32.totalorder %s4491_s21, %s4485_s9 }
 0x151   : > { %v3277_v31 = vsel %vm4947_vm6, %v3275_v4, %v3276_v6 }
 0x152   : > { %v4122_v35 = vcombine.low %v3274_v44, %v3277_v31  ;;  %p4487_p13 = pnand %p4486_p12, %p4629_p4  ;;  %p4494_p3 = por %p4493_p2, %p4492_p1 }
 0x153   : > { %4298 = vmatpush3.bf16.xpose.msra.mxu0 %v3449_v27 }
 0x154   : > { %4377 = vmatprep.subr.msk.bf16.mxu0 %vm739_vm0, %v4133_v56  ;;  %v3437_v49 = vsel %vm739_vm0, %v4122_v35, 0  ;;  %p4488_p0 = pneg %p4487_p13 }
 0x156   : > { %p4495_p5 = pnand %p4494_p3, %p4488_p0 }
 0x15b   : > { %4300 = vmatpush3.bf16.xpose.msra.mxu0 %v3446_v5 }
 0x15c   : > { %4378 = vmatprep.subr.msk.bf16.mxu0 %vm739_vm0, %v4132_v19 }
 0x163   : > { %4302 = vmatpush3.bf16.xpose.msra.mxu0 %v3443_v1 }
 0x164   : > { %4379 = vmatprep.subr.msk.bf16.mxu0 %vm739_vm0, %v4131_v60 }
 0x16b   : > { %4304 = vmatpush3.bf16.xpose.msra.mxu0 %v3440_v2 }
 0x16c   : > { %4380 = vmatprep.subr.msk.bf16.mxu0 %vm739_vm0, %v4130_v14 }
 0x16d   : > { %v1514_v37 = vpop.f32.mrf.mxu1 }
 0x16f   : > { %v1516_v61 = vpop.f32.mrf.mxu1 }
 0x171   : > { %v1518_v63 = vpop.f32.mrf.mxu1 }
 0x173   : > { %4306 = vmatpush3.bf16.xpose.msra.mxu0 %v3437_v49  ;;  %v1302_v0 = vpop.f32.mrf.mxu0  ;;  %v1519_v36 = vpop.f32.mrf.mxu1 }
 0x174   : > { %v1309_v27 = vadd.f32 %v1302_v0, %v5919_v10 }
 0x175   : > { %v1304_v56 = vpop.f32.mrf.mxu0 }
 0x176   : > { %v1310_v24 = vadd.f32 %v1304_v56, %v5932_v59  ;;  %v1521_v50 = vadd.f32 %v1514_v37, %v1309_v27 }
 0x177   : > { %v1306_v48 = vpop.f32.mrf.mxu0 }
 0x178   : > { %v1522_v51 = vadd.f32 %v1516_v61, %v1310_v24 }
 0x179   : > { %v1307_v39 = vpop.f32.mrf.mxu0 }
 0x17a   : > { %4308 = vmatmul.mubr.msk.bf16.vlgmr.msra.gmra.mxu0 %vm739_vm0, %v5909_v23 }
 0x1b4   : > { %v2090_v46 = vpop.f32.mrf.mxu0 }
 0x1b5   : > { %v2097_v20 = vadd.f32 %v2090_v46, %v1521_v50  ;;  %v2410_v22 = vpop.f32.mrf.mxu1 }
 0x1b6   : > { %v2092_v33 = vpop.f32.mrf.mxu0 }
 0x1b7   : > { %v2098_v52 = vadd.f32 %v2092_v33, %v1522_v51  ;;  %v2417_v25 = vadd.f32 %v2410_v22, %v2097_v20  ;;  %v2412_v32 = vpop.f32.mrf.mxu1 }
 0x1b8   : > { %v2094_v53 = vpop.f32.mrf.mxu0 }
 0x1b9   : > { %v2418_v10 = vadd.f32 %v2412_v32, %v2098_v52  ;;  %v2414_v13 = vpop.f32.mrf.mxu1 }
 0x1ba   : > { %v2095_v8 = vpop.f32.mrf.mxu0 }
 0x1bb   : > { %v2415_v59 = vpop.f32.mrf.mxu1 }
 0x1f4   : > { %v2622_v55 = vpop.f32.mrf.mxu0 }
 0x1f5   : > { %v2629_v5 = vadd.f32 %v2622_v55, %v2417_v25 }
 0x1f6   : > { %v2624_v19 = vpop.f32.mrf.mxu0 }
 0x1f7   : > { %v2630_v43 = vadd.f32 %v2624_v19, %v2418_v10 }
 0x1f8   : > { %v2626_v7 = vpop.f32.mrf.mxu0 }
 0x1fa   : > { %v2627_v23 = vpop.f32.mrf.mxu0 }
 0x1ff   : > { %v3198_v47 = vpop.f32.mrf.mxu1 }
 0x200   : > { %v3205_v45 = vadd.f32 %v3198_v47, %v2629_v5 }
 0x201   : > { %v3200_v42 = vpop.f32.mrf.mxu1 }
 0x202   : > { %v3206_v3 = vadd.f32 %v3200_v42, %v2630_v43 }
 0x203   : > { %v3202_v62 = vpop.f32.mrf.mxu1 }
 0x205   : > { %v3203_v28 = vpop.f32.mrf.mxu1 }
 0x23a   : > { %v3518_v12 = vpop.f32.mrf.mxu0 }
 0x23b   : > { %v3525_v30 = vadd.f32 %v3518_v12, %v3205_v45 }
 0x23c   : > { %v3520_v58 = vpop.f32.mrf.mxu0 }
 0x23d   : > { %v3526_v18 = vadd.f32 %v3520_v58, %v3206_v3 }
 0x23e   : > { %v3522_v9 = vpop.f32.mrf.mxu0 }
 0x23f   : > { %v4145_v34 = vpack.c.bf16 %v3526_v18, %v3525_v30  ;;  %v3527_v41 = vadd.f32 %v3526_v18, %v3525_v30 }
 0x240   : > { %v3523_v1 = vpop.f32.mrf.mxu0 }
 0x241   : > { %3528 = vadd.xlane.f32.xlu0 %v3527_v41  ;;  %3549 = vst [vmem:[%s209_s13] sm:$0xff] %v4145_v34 }
 0x2ca   : > { %v3529_v60 = vpop.xlane.xlu0 %3528 }
 0x2cb   : > { %v3530_v15 = vmul.f32 0.00390625, %v3529_v60  ;;  %3534 = vst.msk [vmem:[%s240_s24] sm:$0xff] %vm3533_vm7, %v3529_v60 }
 0x2cd   : > { %v3531_v17 = vsub.f32 %v3525_v30, %v3530_v15  ;;  %v3532_v16 = vsub.f32 %v3526_v18, %v3530_v15 }
 0x2cf   : > { %v3535_v38 = vmul.f32 %v3531_v17, %v3531_v17  ;;  %v3536_v29 = vmul.f32 %v3532_v16, %v3532_v16 }
 0x2d1   : > { %v3537_v21 = vadd.f32 %v3536_v29, %v3535_v38 }
 0x2d3   : > { %3538 = vadd.xlane.f32.xlu0 %v3537_v21 }
 0x2d4   : > { %4498 = shalt.err (!%p4495_p5)
}
 0x2d5   : > { %s4499_s18 = scalar_lea.hbm %s3579_s5, 128  ;;  %s4503_s22 = scalar_lea.hbm %s6109_s2, 256 }
 0x2d6   : > { %p4500_p6 = scmp.ne.s32.totalorder %s3579_s5, %s4499_s18  ;;  %p4504_p10 = scmp.lt.s32.totalorder %s3579_s5, %s6109_s2 }
 0x2d7   : > { %p4505_p11 = scmp.lt.s32.totalorder %s4503_s22, %s4499_s18 }
 0x2d8   : > { %p4501_p7 = pnand %p4500_p6, %p4629_p4 }
 0x2d9   : > { %p4506_p12 = por %p4505_p11, %p4504_p10 }
 0x2da   : > { %p4502_p9 = pneg %p4501_p7 }
 0x2dc   : > { %p4507_p13 = pnand %p4506_p12, %p4502_p9 }
 0x2de   : > { %4510 = shalt.err (!%p4507_p13)
}
 0x2df   : > { %4382 = dma.vmem_to_hbm [thread:$0]  (%p4629_p4), %s3582_s6, 128, %s3579_s5, %s3551_s8  }
 0x2e0   : > { %s247_s9 = scalar_lea.vmem %s6111_s4, %s3736_s14 }
 0x35c   : > { %v3539_v26 = vpop.xlane.xlu0 %3538 }
 0x35d   : > { %3540 = vst.msk [vmem:[%s247_s9] sm:$0xff] %vm3533_vm7, %v3539_v26 }
 0x35e PF: > { %p4388_p0 = scmp.ge.s32.totalorder %s4561_s20, 2  ;;  %s3599_s10 = sand.u32 1, %s4541_s15  }
 0x35f   : > { %s3600_s25 = scalar_lea.sflag [#allocation3], %s3599_s10 }
 0x360   : > { %p4385_p1 = pnand %p4388_p0, %p4636_p8 }
 0x362   : > { %p4386_p2 = pneg %p4385_p1 }
 0x364   : > { %4536 = dma.done.wait (%p4386_p2), %s3600_s25, 128  }
 0x365   : > { %4538 = vsyncadd (%p4386_p2), %s3600_s25, 4294967168  ;;  %s18_s20 = sadd.s32 1, %s4561_s20   ;;  %s6118_s15 = smov %s4545_s16 }
 0x366   : > { %p15_p4 = scmp.ge.s32.totalorder %s18_s20, 4   ;;  %s6119_s16 = smov %s4549_s17 }
 0x367   : > { %s6120_s17 = smov %s4642_s28  ;;  %s6121_s18 = smov %s4557_s19 }
 0x368   : > { %s6122_s19 = smov %s6124_s23  ;;  %17 = sbr.rel (!%p15_p4) target bundleno = 4 (0x4), region = 98 }
 0x36d   :  { %3625 = vsyncpa [#allocation3], 1 }
 0x36e   :  { %3627 = vsyncpa [#allocation3 + $0x1], 1 }

</bundles_post_ra>
